<compile_context>
chip_gen: v7x
topology: tpu7x:2x2x1
jax: 0.10.0
libtpu: 0.0.40
codegen_flags: <defaults>
</compile_context>

<pallas_src>
import jax
import jax.numpy as jnp
import numpy as np
from jax.experimental import pallas as pl
from jax.experimental.pallas import tpu as pltpu


# ----------------------------------------------------------------------------
# Pallas kernel: fused fwd+rev LSTM recurrence, time-chunked.
#   grid = (2 directions, T_pad // Tc)
#   lens_ref : (Bp, 1)            int32   (padded lengths)
#   xproj_ref: (1, Tc, Bp, 4Hp)   bf16    precomputed X@W_ih + b for this dir/chunk
#   whh_ref  : (1, Hp, 4Hp)       bf16    recurrent weights for this dir
#   out_ref  : (Tc, Bp, Hp)       f32     lane block d of the (T_pad,Bp,2Hp) slab
#   h_scr/c_scr: (Bp, Hp) f32 carry across time chunks
# ----------------------------------------------------------------------------
def _bidir_lstm_kernel(lens_ref, xproj_ref, whh_ref, out_ref, h_scr, c_scr):
    d = pl.program_id(0)          # 0 = forward (length-masked output), 1 = reverse
    tc = pl.program_id(1)         # time-chunk index
    Hp = h_scr.shape[-1]
    Tc = xproj_ref.shape[1]

    @pl.when(tc == 0)
    def _():
        h_scr[...] = jnp.zeros_like(h_scr)
        c_scr[...] = jnp.zeros_like(c_scr)

    whh = whh_ref[0]              # (Hp, 4Hp) bf16, loaded once per chunk
    lens = lens_ref[...]          # (Bp, 1) int32
    no_mask = d == 1              # reverse direction output is never masked
    t_base = tc * Tc

    def sigm(x):
        # sigmoid(x) == 0.5 * tanh(0.5 * x) + 0.5 : one EUP push, no VPU divide.
        return 0.5 * jnp.tanh(0.5 * x) + 0.5

    def step(t, carry):
        h, c = carry
        # One fused (Bp,Hp)x(Hp,4Hp) MXU matmul per step; gates i,f,g,o on lanes.
        gates = xproj_ref[0, t].astype(jnp.float32) + jnp.dot(
            h.astype(jnp.bfloat16), whh, preferred_element_type=jnp.float32)
        i_g = sigm(gates[:, 0 * Hp:1 * Hp])
        f_g = sigm(gates[:, 1 * Hp:2 * Hp])
        g_g = jnp.tanh(gates[:, 2 * Hp:3 * Hp])
        o_g = sigm(gates[:, 3 * Hp:4 * Hp])
        c_new = f_g * c + i_g * g_g
        h_new = o_g * jnp.tanh(c_new)
        # Forward direction output is masked by sequence length (in-kernel).
        valid = jnp.logical_or(no_mask, (t_base + t) < lens)      # (Bp, 1) bool
        out_ref[t] = jnp.where(valid, h_new, 0.0).astype(out_ref.dtype)
        return h_new, c_new

    h_fin, c_fin = jax.lax.fori_loop(
        0, Tc, step, (h_scr[...], c_scr[...]), unroll=max(1, min(Tc, 8)))
    h_scr[...] = h_fin
    c_scr[...] = c_fin


# ----------------------------------------------------------------------------
# VMEM budget / chunk selection (generation-aware).
# ----------------------------------------------------------------------------
def _vmem_budget_bytes():
    cap = None
    try:
        info = pltpu.get_tpu_info()
        for attr in ("vmem_capacity_bytes", "vmem_size_bytes", "vmem_bytes"):
            cap = getattr(info, attr, None)
            if cap:
                break
    except Exception:
        cap = None
    if not cap:
        cap = 64 * 1024 * 1024          # conservative (v7x-sized) fallback
    return int(cap) * 3 // 4            # ~48 MiB on v7x, ~96 MiB on v5e/v6e


def _choose_time_chunk(T, Bp, Hp, budget):
    G = 4 * Hp
    fixed = 2 * Hp * G * 2              # W_hh, bf16, double-buffered
    fixed += 2 * Bp * 128 * 4           # lengths block (lane-padded), double-buffered
    fixed += 2 * Bp * Hp * 4            # h/c f32 scratch
    fixed += 2 * 1024 * 1024            # Mosaic internal scratch / semaphores margin
    per_t = 2 * (Bp * G * 2) + 2 * (Bp * Hp * 4)   # xproj (bf16) + out (f32), 2-buffered
    tc = (budget - fixed) // per_t
    tc = max(1, min(int(tc), 256, T))
    return tc


# ----------------------------------------------------------------------------
# pallas_call wrapper.
#   xproj: (2, T, Bp, 4Hp) bf16; w_hh: (2, Hp, 4Hp) bf16; lens_2d: (Bp, 1) int32
#   -> (T_pad, Bp, 2*Hp) f32 slab: lanes [0:Hp] = masked fwd, [Hp:2Hp] = rev.
# ----------------------------------------------------------------------------
def _bidir_lstm_pallas(xproj, w_hh, lens_2d):
    _, T, Bp, G = xproj.shape
    Hp = w_hh.shape[1]

    budget = _vmem_budget_bytes()
    t_chunk = _choose_time_chunk(T, Bp, Hp, budget)
    n_chunks = -(-T // t_chunk)
    T_pad = n_chunks * t_chunk
    if T_pad != T:
        xproj = jnp.pad(xproj, ((0, 0), (0, T_pad - T), (0, 0), (0, 0)))

    # TODO(synk): pl.Buffered(1) on the constant W_hh block would save one
    #   Hp*4Hp bf16 buffer of VMEM on v7x; kept default-buffered (and budgeted
    #   for) to stay on the well-trodden pipeline path.
    return pl.pallas_call(
        _bidir_lstm_kernel,
        out_shape=jax.ShapeDtypeStruct((T_pad, Bp, 2 * Hp), jnp.float32),
        grid_spec=pltpu.PrefetchScalarGridSpec(
            num_scalar_prefetch=0,
            grid=(2, n_chunks),
            in_specs=[
                pl.BlockSpec((Bp, 1), lambda d, t: (0, 0)),                    # lengths
                pl.BlockSpec((1, t_chunk, Bp, G), lambda d, t: (d, t, 0, 0)),  # X@W_ih + b
                pl.BlockSpec((1, Hp, G), lambda d, t: (d, 0, 0)),              # W_hh
            ],
            out_specs=pl.BlockSpec((t_chunk, Bp, Hp), lambda d, t: (t, 0, d)),
            scratch_shapes=[
                pltpu.VMEM((Bp, Hp), jnp.float32),   # h carry
                pltpu.VMEM((Bp, Hp), jnp.float32),   # c carry
            ],
        ),
        compiler_params=pltpu.CompilerParams(
            # Directions are independent scans -> shard across TCs on v7x;
            # time is a serial recurrence.
            dimension_semantics=("parallel", "arbitrary"),
            vmem_limit_bytes=int(budget),
        ),
    )(lens_2d, xproj, w_hh)


# ----------------------------------------------------------------------------
# Glue: revert_varlen, parameter packing (plain JAX).
# ----------------------------------------------------------------------------
def revert_varlen(x, lengths):
    """Reverse each batch element's first `lengths[b]` time steps; padding stays."""
    T, B = x.shape[0], x.shape[1]
    t_idx = jnp.arange(T)[:, None]                                  # (T, 1)
    lens = lengths[None, :]                                         # (1, B)
    src = jnp.where(t_idx < lens, lens - 1 - t_idx, t_idx)          # (T, B)
    b_idx = jnp.arange(B)[None, :]                                  # (1, B)
    return x[src, b_idx, :]                                         # (T, B, F)


def pack_lstm_params(w_ih, w_hh, b_ih, b_hh, lane=128):
    """PyTorch (4H,I)/(4H,H)/(4H,)/(4H,) -> fused (I,4Hp) bf16, (Hp,4Hp) bf16,
    (4Hp,) f32, with H padded to a multiple of 128 using GATE-ALIGNED zero
    padding (i,f,g,o lane slices of width Hp stay gate-pure)."""
    H = w_hh.shape[1]
    Hp = max(lane, ((H + lane - 1) // lane) * lane)
    pad = Hp - H

    def pad_gate_rows(w):                               # (4H, X) -> (4Hp, X)
        w4 = w.reshape(4, H, w.shape[-1])
        w4 = jnp.pad(w4, ((0, 0), (0, pad), (0, 0)))
        return w4.reshape(4 * Hp, w.shape[-1])

    w_ih_p = pad_gate_rows(w_ih)                                    # (4Hp, I)
    w_hh_p = jnp.pad(pad_gate_rows(w_hh), ((0, 0), (0, pad)))       # (4Hp, Hp)
    b_p = jnp.pad((b_ih + b_hh).reshape(4, H), ((0, 0), (0, pad))).reshape(4 * Hp)

    w_ih_k = jnp.transpose(w_ih_p).astype(jnp.bfloat16)             # (I, 4Hp)
    w_hh_k = jnp.transpose(w_hh_p).astype(jnp.bfloat16)             # (Hp, 4Hp)
    return w_ih_k, w_hh_k, b_p.astype(jnp.float32)


def emu_bidir_lstm_forward(x, lengths, params):
    """Reproduces EmuBidirLSTM.forward for batch <= 128 (the emu path)."""
    T, B, I = x.shape
    if B > 128:
        # TODO(synk): cudnn packed bidirectional path (pack_padded_sequence) not
        # implemented; only the emu path (B <= 128) is reproduced here.
        raise NotImplementedError("packed bidir path (batch > 128) not implemented")

    wih_f, whh_f, b_f = params["fwd"]
    wih_r, whh_r, b_r = params["rev"]
    H = params["hidden_size"]
    Hp = whh_f.shape[0]

    # Pad batch to a multiple of 8 (f32 sublane count) only — no over-padding.
    B_pad = max(8, ((B + 7) // 8) * 8)
    if B_pad != B:
        x_p = jnp.pad(x, ((0, 0), (0, B_pad - B), (0, 0)))
        lens_p = jnp.pad(lengths, (0, B_pad - B))
    else:
        x_p, lens_p = x, lengths
    lens_p = lens_p.astype(jnp.int32)

    # model1 (reverse weights) runs on the per-sequence reversed input.
    x_rev = revert_varlen(x_p, lens_p)

    # Hoisted input projection for both directions + folded bias, stored bf16.
    x_stack = jnp.stack([x_p, x_rev], axis=0).astype(jnp.bfloat16)   # (2, T, Bp, I)
    w_ih_stack = jnp.stack([wih_f, wih_r], axis=0)                   # (2, I, 4Hp) bf16
    b_stack = jnp.stack([b_f, b_r], axis=0)                          # (2, 4Hp) f32
    xproj = jnp.einsum("dtbi,dik->dtbk", x_stack, w_ih_stack,
                       preferred_element_type=jnp.float32)
    xproj = (xproj + b_stack[:, None, None, :]).astype(jnp.bfloat16)  # (2,T,Bp,4Hp)

    w_hh_stack = jnp.stack([whh_f, whh_r], axis=0)                   # (2, Hp, 4Hp) bf16
    lens_2d = lens_p[:, None]                                        # (Bp, 1)

    out_slab = _bidir_lstm_pallas(xproj, w_hh_stack, lens_2d)        # (T_pad, Bp, 2Hp)

    out_f = out_slab[:T, :B, :H]                            # already length-masked
    out_r = revert_varlen(out_slab[:T, :B, Hp:Hp + H],
                          lengths.astype(jnp.int32))        # un-reverse reverse dir
    return jnp.concatenate([out_f, out_r], axis=2)          # (T, B, 2H)


# ----------------------------------------------------------------------------
# Pure-JAX f32 reference (lax.scan) for correctness checking.
# ----------------------------------------------------------------------------
def _lstm_ref(x, w_ih, w_hh, b_ih, b_hh):
    T, B, _ = x.shape
    H = w_hh.shape[1]

    def step(carry, x_t):
        h, c = carry
        gates = x_t @ w_ih.T + b_ih + h @ w_hh.T + b_hh
        i, f, g, o = jnp.split(gates, 4, axis=-1)
        c = jax.nn.sigmoid(f) * c + jax.nn.sigmoid(i) * jnp.tanh(g)
        h = jax.nn.sigmoid(o) * jnp.tanh(c)
        return (h, c), h

    _, ys = jax.lax.scan(step, (jnp.zeros((B, H)), jnp.zeros((B, H))), x)
    return ys


def _set_mask(lengths, T, dtype):
    return (jnp.arange(T)[:, None] < lengths[None, :]).astype(dtype)[:, :, None]


def _emu_ref(x, lengths, raw):
    T = x.shape[0]
    mask = _set_mask(lengths, T, x.dtype)
    x_rev = revert_varlen(x, lengths)
    out1 = _lstm_ref(x_rev, raw["w_ih_r"], raw["w_hh_r"], raw["b_ih_r"], raw["b_hh_r"])
    outputs = revert_varlen(out1, lengths)
    out0 = _lstm_ref(x, raw["w_ih_f"], raw["w_hh_f"], raw["b_ih_f"], raw["b_hh_f"]) * mask
    return jnp.concatenate([out0, outputs], axis=2)


# ----------------------------------------------------------------------------
# Main
# ----------------------------------------------------------------------------
if __name__ == "__main__":
    # Small shapes consistent with the module: seq=8, batch=4 (<=128 -> emu path),
    # input_size=16, hidden_size=32.
    T, B, I, H = 8, 4, 16, 32

    key = jax.random.PRNGKey(0)
    keys = jax.random.split(key, 10)

    # Deterministic param init mimicking nn.LSTM: U(-1/sqrt(H), 1/sqrt(H)).
    bound = 1.0 / np.sqrt(H)
    u = lambda k, shape: jax.random.uniform(k, shape, jnp.float32, -bound, bound)

    raw = {
        "w_ih_f": u(keys[0], (4 * H, I)), "w_hh_f": u(keys[1], (4 * H, H)),
        "b_ih_f": u(keys[2], (4 * H,)),   "b_hh_f": u(keys[3], (4 * H,)),
        "w_ih_r": u(keys[4], (4 * H, I)), "w_hh_r": u(keys[5], (4 * H, H)),
        "b_ih_r": u(keys[6], (4 * H,)),   "b_hh_r": u(keys[7], (4 * H,)),
    }
    params = {
        "fwd": pack_lstm_params(raw["w_ih_f"], raw["w_hh_f"], raw["b_ih_f"], raw["b_hh_f"]),
        "rev": pack_lstm_params(raw["w_ih_r"], raw["w_hh_r"], raw["b_ih_r"], raw["b_hh_r"]),
        "hidden_size": H,
    }

    x = jax.random.normal(keys[8], (T, B, I), jnp.float32)
    lengths = jnp.array([8, 7, 5, 3], dtype=jnp.int32)   # sorted descending, as in packing

    out = emu_bidir_lstm_forward(x, lengths, params)
    out = jax.block_until_ready(out)
    assert out.shape == (T, B, 2 * H), out.shape

    ref = jax.block_until_ready(_emu_ref(x, lengths, raw))
    # Tolerance accounts for bf16 MXU operands / bf16-stored xproj
    # (f32 accumulation, f32 h/c carries and gate math).
    np.testing.assert_allclose(np.asarray(out), np.asarray(ref), rtol=2e-2, atol=2e-2)

    print("KERNEL_OK")
</pallas_src>

<mosaic_0001>
module attributes {stable_mosaic.version = 11 : i64} {
  func.func @_bidir_lstm_kernel(%arg0: i32, %arg1: i32, %arg2: memref<8x1xi32, #tpu.memory_space<vmem>>, %arg3: memref<1x8x8x512xbf16, #tpu.memory_space<vmem>>, %arg4: memref<1x128x512xbf16, #tpu.memory_space<vmem>>, %arg5: memref<8x8x128xf32, #tpu.memory_space<vmem>>, %arg6: memref<8x128xf32, #tpu.memory_space<vmem>>, %arg7: memref<8x128xf32, #tpu.memory_space<vmem>>) attributes {dimension_semantics = [#tpu.dimension_semantics<parallel>, #tpu.dimension_semantics<arbitrary>], iteration_bounds = array<i64: 2, 1>, scalar_prefetch = 0 : i64, scratch_operands = 2 : i64, tpu.core_type = #tpu.core_type<tc>, window_params = [{pipeline_mode = #tpu.pipeline_mode<synchronous>, transform_indices = @transform_0, window_bounds = array<i64: 8, 1>}, {transform_indices = @transform_1, window_bounds = array<i64: 1, 8, 8, 512>}, {transform_indices = @transform_2, window_bounds = array<i64: 1, 128, 512>}, {transform_indices = @transform_3, window_bounds = array<i64: 8, 8, 128>}]} {
    %c0_i32 = arith.constant 0 : i32
    %0 = arith.cmpi eq, %arg1, %c0_i32 : i32
    %1 = arith.extui %0 : i1 to i32
    %c0_i32_0 = arith.constant 0 : i32
    %2 = arith.cmpi ne, %1, %c0_i32_0 : i32
    scf.if %2 {
      %cst_143 = arith.constant 0.000000e+00 : f32
      %420 = vector.broadcast %cst_143 : f32 to vector<8x128xf32>
      %c0_144 = arith.constant 0 : index
      %c0_145 = arith.constant 0 : index
      %421 = vector.load %arg6[%c0_144, %c0_145] : memref<8x128xf32, #tpu.memory_space<vmem>>, vector<8x128xf32>
      tpu.vector_store %arg6[%c0_144, %c0_145], %420 {strides = array<i32>} : memref<8x128xf32, #tpu.memory_space<vmem>>, vector<8x128xf32>,
      %cst_146 = arith.constant 0.000000e+00 : f32
      %422 = vector.broadcast %cst_146 : f32 to vector<8x128xf32>
      %c0_147 = arith.constant 0 : index
      %c0_148 = arith.constant 0 : index
      %423 = vector.load %arg7[%c0_147, %c0_148] : memref<8x128xf32, #tpu.memory_space<vmem>>, vector<8x128xf32>
      tpu.vector_store %arg7[%c0_147, %c0_148], %422 {strides = array<i32>} : memref<8x128xf32, #tpu.memory_space<vmem>>, vector<8x128xf32>,
    } else {
    }
    %c0 = arith.constant 0 : index
    %c0_1 = arith.constant 0 : index
    %c0_2 = arith.constant 0 : index
    %3 = vector.load %arg4[%c0, %c0_1, %c0_2] : memref<1x128x512xbf16, #tpu.memory_space<vmem>>, vector<1x128x512xbf16>
    %4 = vector.shape_cast %3 : vector<1x128x512xbf16> to vector<128x512xbf16>
    %c0_3 = arith.constant 0 : index
    %c0_4 = arith.constant 0 : index
    %5 = vector.load %arg2[%c0_3, %c0_4] : memref<8x1xi32, #tpu.memory_space<vmem>>, vector<8x1xi32>
    %c1_i32 = arith.constant 1 : i32
    %6 = arith.cmpi eq, %arg0, %c1_i32 : i32
    %c8_i32 = arith.constant 8 : i32
    %7 = arith.muli %arg1, %c8_i32 : i32
    %c0_5 = arith.constant 0 : index
    %c0_6 = arith.constant 0 : index
    %8 = vector.load %arg6[%c0_5, %c0_6] : memref<8x128xf32, #tpu.memory_space<vmem>>, vector<8x128xf32>
    %c0_7 = arith.constant 0 : index
    %c0_8 = arith.constant 0 : index
    %9 = vector.load %arg7[%c0_7, %c0_8] : memref<8x128xf32, #tpu.memory_space<vmem>>, vector<8x128xf32>
    %c0_i32_9 = arith.constant 0 : i32
    %c0_10 = arith.constant 0 : index
    %10 = arith.index_cast %c0_i32_9 : i32 to index
    %c0_11 = arith.constant 0 : index
    %c0_12 = arith.constant 0 : index
    %11 = vector.load %arg3[%c0_10, %10, %c0_11, %c0_12] : memref<1x8x8x512xbf16, #tpu.memory_space<vmem>>, vector<1x1x8x512xbf16>
    %12 = vector.shape_cast %11 : vector<1x1x8x512xbf16> to vector<8x512xbf16>
    %13 = arith.extf %12 : vector<8x512xbf16> to vector<8x512xf32>
    %14 = arith.truncf %8 : vector<8x128xf32> to vector<8x128xbf16>
    %cst = arith.constant dense<0.000000e+00> : vector<8x512xf32>
    %15 = tpu.matmul %14, %4, %cst {dimension_numbers = #tpu.dot_dimension_numbers<[1], [0], [0], [1], [0, 0, 1, 1], [], []>} : vector<8x128xbf16>, vector<128x512xbf16>, vector<8x512xf32> -> vector<8x512xf32>
    %16 = arith.addf %13, %15 : vector<8x512xf32>
    %17 = vector.extract_strided_slice %16 {offsets = [0, 0], sizes = [8, 128], strides = [1, 1]} : vector<8x512xf32> to vector<8x128xf32>
    %cst_13 = arith.constant 5.000000e-01 : f32
    %18 = vector.broadcast %cst_13 : f32 to vector<8x128xf32>
    %19 = arith.mulf %18, %17 : vector<8x128xf32>
    %20 = math.tanh %19 : vector<8x128xf32>
    %cst_14 = arith.constant 5.000000e-01 : f32
    %21 = vector.broadcast %cst_14 : f32 to vector<8x128xf32>
    %22 = arith.mulf %21, %20 : vector<8x128xf32>
    %cst_15 = arith.constant 5.000000e-01 : f32
    %23 = vector.broadcast %cst_15 : f32 to vector<8x128xf32>
    %24 = arith.addf %22, %23 : vector<8x128xf32>
    %25 = vector.extract_strided_slice %16 {offsets = [0, 128], sizes = [8, 128], strides = [1, 1]} : vector<8x512xf32> to vector<8x128xf32>
    %cst_16 = arith.constant 5.000000e-01 : f32
    %26 = vector.broadcast %cst_16 : f32 to vector<8x128xf32>
    %27 = arith.mulf %26, %25 : vector<8x128xf32>
    %28 = math.tanh %27 : vector<8x128xf32>
    %cst_17 = arith.constant 5.000000e-01 : f32
    %29 = vector.broadcast %cst_17 : f32 to vector<8x128xf32>
    %30 = arith.mulf %29, %28 : vector<8x128xf32>
    %cst_18 = arith.constant 5.000000e-01 : f32
    %31 = vector.broadcast %cst_18 : f32 to vector<8x128xf32>
    %32 = arith.addf %30, %31 : vector<8x128xf32>
    %33 = vector.extract_strided_slice %16 {offsets = [0, 256], sizes = [8, 128], strides = [1, 1]} : vector<8x512xf32> to vector<8x128xf32>
    %34 = math.tanh %33 : vector<8x128xf32>
    %35 = vector.extract_strided_slice %16 {offsets = [0, 384], sizes = [8, 128], strides = [1, 1]} : vector<8x512xf32> to vector<8x128xf32>
    %cst_19 = arith.constant 5.000000e-01 : f32
    %36 = vector.broadcast %cst_19 : f32 to vector<8x128xf32>
    %37 = arith.mulf %36, %35 : vector<8x128xf32>
    %38 = math.tanh %37 : vector<8x128xf32>
    %cst_20 = arith.constant 5.000000e-01 : f32
    %39 = vector.broadcast %cst_20 : f32 to vector<8x128xf32>
    %40 = arith.mulf %39, %38 : vector<8x128xf32>
    %cst_21 = arith.constant 5.000000e-01 : f32
    %41 = vector.broadcast %cst_21 : f32 to vector<8x128xf32>
    %42 = arith.addf %40, %41 : vector<8x128xf32>
    %43 = arith.mulf %32, %9 : vector<8x128xf32>
    %44 = arith.mulf %24, %34 : vector<8x128xf32>
    %45 = arith.addf %43, %44 : vector<8x128xf32>
    %46 = math.tanh %45 : vector<8x128xf32>
    %47 = arith.mulf %42, %46 : vector<8x128xf32>
    %48 = arith.addi %7, %c0_i32_9 : i32
    %49 = vector.broadcast %48 : i32 to vector<8x1xi32>
    %50 = arith.cmpi slt, %49, %5 : vector<8x1xi32>
    %51 = vector.broadcast %6 : i1 to vector<8x1xi1>
    %52 = arith.ori %51, %50 : vector<8x1xi1>
    %cst_22 = arith.constant 0.000000e+00 : f32
    %53 = vector.shape_cast %52 : vector<8x1xi1> to vector<8x1xi1>
    %54 = vector.broadcast %53 : vector<8x1xi1> to vector<8x128xi1>
    %55 = vector.broadcast %cst_22 : f32 to vector<8x128xf32>
    %56 = arith.select %54, %47, %55 : vector<8x128xi1>, vector<8x128xf32>
    %57 = arith.index_cast %c0_i32_9 : i32 to index
    %c0_23 = arith.constant 0 : index
    %c0_24 = arith.constant 0 : index
    %58 = vector.load %arg5[%57, %c0_23, %c0_24] : memref<8x8x128xf32, #tpu.memory_space<vmem>>, vector<1x8x128xf32>
    %59 = vector.shape_cast %58 : vector<1x8x128xf32> to vector<8x128xf32>
    %60 = vector.shape_cast %56 : vector<8x128xf32> to vector<1x8x128xf32>
    tpu.vector_store %arg5[%57, %c0_23, %c0_24], %60 {strides = array<i32>} : memref<8x8x128xf32, #tpu.memory_space<vmem>>, vector<1x8x128xf32>,
    %c1_i32_25 = arith.constant 1 : i32
    %c0_26 = arith.constant 0 : index
    %61 = arith.index_cast %c1_i32_25 : i32 to index
    %c0_27 = arith.constant 0 : index
    %c0_28 = arith.constant 0 : index
    %62 = vector.load %arg3[%c0_26, %61, %c0_27, %c0_28] : memref<1x8x8x512xbf16, #tpu.memory_space<vmem>>, vector<1x1x8x512xbf16>
    %63 = vector.shape_cast %62 : vector<1x1x8x512xbf16> to vector<8x512xbf16>
    %64 = arith.extf %63 : vector<8x512xbf16> to vector<8x512xf32>
    %65 = arith.truncf %47 : vector<8x128xf32> to vector<8x128xbf16>
    %cst_29 = arith.constant dense<0.000000e+00> : vector<8x512xf32>
    %66 = tpu.matmul %65, %4, %cst_29 {dimension_numbers = #tpu.dot_dimension_numbers<[1], [0], [0], [1], [0, 0, 1, 1], [], []>} : vector<8x128xbf16>, vector<128x512xbf16>, vector<8x512xf32> -> vector<8x512xf32>
    %67 = arith.addf %64, %66 : vector<8x512xf32>
    %68 = vector.extract_strided_slice %67 {offsets = [0, 0], sizes = [8, 128], strides = [1, 1]} : vector<8x512xf32> to vector<8x128xf32>
    %cst_30 = arith.constant 5.000000e-01 : f32
    %69 = vector.broadcast %cst_30 : f32 to vector<8x128xf32>
    %70 = arith.mulf %69, %68 : vector<8x128xf32>
    %71 = math.tanh %70 : vector<8x128xf32>
    %cst_31 = arith.constant 5.000000e-01 : f32
    %72 = vector.broadcast %cst_31 : f32 to vector<8x128xf32>
    %73 = arith.mulf %72, %71 : vector<8x128xf32>
    %cst_32 = arith.constant 5.000000e-01 : f32
    %74 = vector.broadcast %cst_32 : f32 to vector<8x128xf32>
    %75 = arith.addf %73, %74 : vector<8x128xf32>
    %76 = vector.extract_strided_slice %67 {offsets = [0, 128], sizes = [8, 128], strides = [1, 1]} : vector<8x512xf32> to vector<8x128xf32>
    %cst_33 = arith.constant 5.000000e-01 : f32
    %77 = vector.broadcast %cst_33 : f32 to vector<8x128xf32>
    %78 = arith.mulf %77, %76 : vector<8x128xf32>
    %79 = math.tanh %78 : vector<8x128xf32>
    %cst_34 = arith.constant 5.000000e-01 : f32
    %80 = vector.broadcast %cst_34 : f32 to vector<8x128xf32>
    %81 = arith.mulf %80, %79 : vector<8x128xf32>
    %cst_35 = arith.constant 5.000000e-01 : f32
    %82 = vector.broadcast %cst_35 : f32 to vector<8x128xf32>
    %83 = arith.addf %81, %82 : vector<8x128xf32>
    %84 = vector.extract_strided_slice %67 {offsets = [0, 256], sizes = [8, 128], strides = [1, 1]} : vector<8x512xf32> to vector<8x128xf32>
    %85 = math.tanh %84 : vector<8x128xf32>
    %86 = vector.extract_strided_slice %67 {offsets = [0, 384], sizes = [8, 128], strides = [1, 1]} : vector<8x512xf32> to vector<8x128xf32>
    %cst_36 = arith.constant 5.000000e-01 : f32
    %87 = vector.broadcast %cst_36 : f32 to vector<8x128xf32>
    %88 = arith.mulf %87, %86 : vector<8x128xf32>
    %89 = math.tanh %88 : vector<8x128xf32>
    %cst_37 = arith.constant 5.000000e-01 : f32
    %90 = vector.broadcast %cst_37 : f32 to vector<8x128xf32>
    %91 = arith.mulf %90, %89 : vector<8x128xf32>
    %cst_38 = arith.constant 5.000000e-01 : f32
    %92 = vector.broadcast %cst_38 : f32 to vector<8x128xf32>
    %93 = arith.addf %91, %92 : vector<8x128xf32>
    %94 = arith.mulf %83, %45 : vector<8x128xf32>
    %95 = arith.mulf %75, %85 : vector<8x128xf32>
    %96 = arith.addf %94, %95 : vector<8x128xf32>
    %97 = math.tanh %96 : vector<8x128xf32>
    %98 = arith.mulf %93, %97 : vector<8x128xf32>
    %99 = arith.addi %7, %c1_i32_25 : i32
    %100 = vector.broadcast %99 : i32 to vector<8x1xi32>
    %101 = arith.cmpi slt, %100, %5 : vector<8x1xi32>
    %102 = vector.broadcast %6 : i1 to vector<8x1xi1>
    %103 = arith.ori %102, %101 : vector<8x1xi1>
    %cst_39 = arith.constant 0.000000e+00 : f32
    %104 = vector.shape_cast %103 : vector<8x1xi1> to vector<8x1xi1>
    %105 = vector.broadcast %104 : vector<8x1xi1> to vector<8x128xi1>
    %106 = vector.broadcast %cst_39 : f32 to vector<8x128xf32>
    %107 = arith.select %105, %98, %106 : vector<8x128xi1>, vector<8x128xf32>
    %108 = arith.index_cast %c1_i32_25 : i32 to index
    %c0_40 = arith.constant 0 : index
    %c0_41 = arith.constant 0 : index
    %109 = vector.load %arg5[%108, %c0_40, %c0_41] : memref<8x8x128xf32, #tpu.memory_space<vmem>>, vector<1x8x128xf32>
    %110 = vector.shape_cast %109 : vector<1x8x128xf32> to vector<8x128xf32>
    %111 = vector.shape_cast %107 : vector<8x128xf32> to vector<1x8x128xf32>
    tpu.vector_store %arg5[%108, %c0_40, %c0_41], %111 {strides = array<i32>} : memref<8x8x128xf32, #tpu.memory_space<vmem>>, vector<1x8x128xf32>,
    %c2_i32 = arith.constant 2 : i32
    %c0_42 = arith.constant 0 : index
    %112 = arith.index_cast %c2_i32 : i32 to index
    %c0_43 = arith.constant 0 : index
    %c0_44 = arith.constant 0 : index
    %113 = vector.load %arg3[%c0_42, %112, %c0_43, %c0_44] : memref<1x8x8x512xbf16, #tpu.memory_space<vmem>>, vector<1x1x8x512xbf16>
    %114 = vector.shape_cast %113 : vector<1x1x8x512xbf16> to vector<8x512xbf16>
    %115 = arith.extf %114 : vector<8x512xbf16> to vector<8x512xf32>
    %116 = arith.truncf %98 : vector<8x128xf32> to vector<8x128xbf16>
    %cst_45 = arith.constant dense<0.000000e+00> : vector<8x512xf32>
    %117 = tpu.matmul %116, %4, %cst_45 {dimension_numbers = #tpu.dot_dimension_numbers<[1], [0], [0], [1], [0, 0, 1, 1], [], []>} : vector<8x128xbf16>, vector<128x512xbf16>, vector<8x512xf32> -> vector<8x512xf32>
    %118 = arith.addf %115, %117 : vector<8x512xf32>
    %119 = vector.extract_strided_slice %118 {offsets = [0, 0], sizes = [8, 128], strides = [1, 1]} : vector<8x512xf32> to vector<8x128xf32>
    %cst_46 = arith.constant 5.000000e-01 : f32
    %120 = vector.broadcast %cst_46 : f32 to vector<8x128xf32>
    %121 = arith.mulf %120, %119 : vector<8x128xf32>
    %122 = math.tanh %121 : vector<8x128xf32>
    %cst_47 = arith.constant 5.000000e-01 : f32
    %123 = vector.broadcast %cst_47 : f32 to vector<8x128xf32>
    %124 = arith.mulf %123, %122 : vector<8x128xf32>
    %cst_48 = arith.constant 5.000000e-01 : f32
    %125 = vector.broadcast %cst_48 : f32 to vector<8x128xf32>
    %126 = arith.addf %124, %125 : vector<8x128xf32>
    %127 = vector.extract_strided_slice %118 {offsets = [0, 128], sizes = [8, 128], strides = [1, 1]} : vector<8x512xf32> to vector<8x128xf32>
    %cst_49 = arith.constant 5.000000e-01 : f32
    %128 = vector.broadcast %cst_49 : f32 to vector<8x128xf32>
    %129 = arith.mulf %128, %127 : vector<8x128xf32>
    %130 = math.tanh %129 : vector<8x128xf32>
    %cst_50 = arith.constant 5.000000e-01 : f32
    %131 = vector.broadcast %cst_50 : f32 to vector<8x128xf32>
    %132 = arith.mulf %131, %130 : vector<8x128xf32>
    %cst_51 = arith.constant 5.000000e-01 : f32
    %133 = vector.broadcast %cst_51 : f32 to vector<8x128xf32>
    %134 = arith.addf %132, %133 : vector<8x128xf32>
    %135 = vector.extract_strided_slice %118 {offsets = [0, 256], sizes = [8, 128], strides = [1, 1]} : vector<8x512xf32> to vector<8x128xf32>
    %136 = math.tanh %135 : vector<8x128xf32>
    %137 = vector.extract_strided_slice %118 {offsets = [0, 384], sizes = [8, 128], strides = [1, 1]} : vector<8x512xf32> to vector<8x128xf32>
    %cst_52 = arith.constant 5.000000e-01 : f32
    %138 = vector.broadcast %cst_52 : f32 to vector<8x128xf32>
    %139 = arith.mulf %138, %137 : vector<8x128xf32>
    %140 = math.tanh %139 : vector<8x128xf32>
    %cst_53 = arith.constant 5.000000e-01 : f32
    %141 = vector.broadcast %cst_53 : f32 to vector<8x128xf32>
    %142 = arith.mulf %141, %140 : vector<8x128xf32>
    %cst_54 = arith.constant 5.000000e-01 : f32
    %143 = vector.broadcast %cst_54 : f32 to vector<8x128xf32>
    %144 = arith.addf %142, %143 : vector<8x128xf32>
    %145 = arith.mulf %134, %96 : vector<8x128xf32>
    %146 = arith.mulf %126, %136 : vector<8x128xf32>
    %147 = arith.addf %145, %146 : vector<8x128xf32>
    %148 = math.tanh %147 : vector<8x128xf32>
    %149 = arith.mulf %144, %148 : vector<8x128xf32>
    %150 = arith.addi %7, %c2_i32 : i32
    %151 = vector.broadcast %150 : i32 to vector<8x1xi32>
    %152 = arith.cmpi slt, %151, %5 : vector<8x1xi32>
    %153 = vector.broadcast %6 : i1 to vector<8x1xi1>
    %154 = arith.ori %153, %152 : vector<8x1xi1>
    %cst_55 = arith.constant 0.000000e+00 : f32
    %155 = vector.shape_cast %154 : vector<8x1xi1> to vector<8x1xi1>
    %156 = vector.broadcast %155 : vector<8x1xi1> to vector<8x128xi1>
    %157 = vector.broadcast %cst_55 : f32 to vector<8x128xf32>
    %158 = arith.select %156, %149, %157 : vector<8x128xi1>, vector<8x128xf32>
    %159 = arith.index_cast %c2_i32 : i32 to index
    %c0_56 = arith.constant 0 : index
    %c0_57 = arith.constant 0 : index
    %160 = vector.load %arg5[%159, %c0_56, %c0_57] : memref<8x8x128xf32, #tpu.memory_space<vmem>>, vector<1x8x128xf32>
    %161 = vector.shape_cast %160 : vector<1x8x128xf32> to vector<8x128xf32>
    %162 = vector.shape_cast %158 : vector<8x128xf32> to vector<1x8x128xf32>
    tpu.vector_store %arg5[%159, %c0_56, %c0_57], %162 {strides = array<i32>} : memref<8x8x128xf32, #tpu.memory_space<vmem>>, vector<1x8x128xf32>,
    %c3_i32 = arith.constant 3 : i32
    %c0_58 = arith.constant 0 : index
    %163 = arith.index_cast %c3_i32 : i32 to index
    %c0_59 = arith.constant 0 : index
    %c0_60 = arith.constant 0 : index
    %164 = vector.load %arg3[%c0_58, %163, %c0_59, %c0_60] : memref<1x8x8x512xbf16, #tpu.memory_space<vmem>>, vector<1x1x8x512xbf16>
    %165 = vector.shape_cast %164 : vector<1x1x8x512xbf16> to vector<8x512xbf16>
    %166 = arith.extf %165 : vector<8x512xbf16> to vector<8x512xf32>
    %167 = arith.truncf %149 : vector<8x128xf32> to vector<8x128xbf16>
    %cst_61 = arith.constant dense<0.000000e+00> : vector<8x512xf32>
    %168 = tpu.matmul %167, %4, %cst_61 {dimension_numbers = #tpu.dot_dimension_numbers<[1], [0], [0], [1], [0, 0, 1, 1], [], []>} : vector<8x128xbf16>, vector<128x512xbf16>, vector<8x512xf32> -> vector<8x512xf32>
    %169 = arith.addf %166, %168 : vector<8x512xf32>
    %170 = vector.extract_strided_slice %169 {offsets = [0, 0], sizes = [8, 128], strides = [1, 1]} : vector<8x512xf32> to vector<8x128xf32>
    %cst_62 = arith.constant 5.000000e-01 : f32
    %171 = vector.broadcast %cst_62 : f32 to vector<8x128xf32>
    %172 = arith.mulf %171, %170 : vector<8x128xf32>
    %173 = math.tanh %172 : vector<8x128xf32>
    %cst_63 = arith.constant 5.000000e-01 : f32
    %174 = vector.broadcast %cst_63 : f32 to vector<8x128xf32>
    %175 = arith.mulf %174, %173 : vector<8x128xf32>
    %cst_64 = arith.constant 5.000000e-01 : f32
    %176 = vector.broadcast %cst_64 : f32 to vector<8x128xf32>
    %177 = arith.addf %175, %176 : vector<8x128xf32>
    %178 = vector.extract_strided_slice %169 {offsets = [0, 128], sizes = [8, 128], strides = [1, 1]} : vector<8x512xf32> to vector<8x128xf32>
    %cst_65 = arith.constant 5.000000e-01 : f32
    %179 = vector.broadcast %cst_65 : f32 to vector<8x128xf32>
    %180 = arith.mulf %179, %178 : vector<8x128xf32>
    %181 = math.tanh %180 : vector<8x128xf32>
    %cst_66 = arith.constant 5.000000e-01 : f32
    %182 = vector.broadcast %cst_66 : f32 to vector<8x128xf32>
    %183 = arith.mulf %182, %181 : vector<8x128xf32>
    %cst_67 = arith.constant 5.000000e-01 : f32
    %184 = vector.broadcast %cst_67 : f32 to vector<8x128xf32>
    %185 = arith.addf %183, %184 : vector<8x128xf32>
    %186 = vector.extract_strided_slice %169 {offsets = [0, 256], sizes = [8, 128], strides = [1, 1]} : vector<8x512xf32> to vector<8x128xf32>
    %187 = math.tanh %186 : vector<8x128xf32>
    %188 = vector.extract_strided_slice %169 {offsets = [0, 384], sizes = [8, 128], strides = [1, 1]} : vector<8x512xf32> to vector<8x128xf32>
    %cst_68 = arith.constant 5.000000e-01 : f32
    %189 = vector.broadcast %cst_68 : f32 to vector<8x128xf32>
    %190 = arith.mulf %189, %188 : vector<8x128xf32>
    %191 = math.tanh %190 : vector<8x128xf32>
    %cst_69 = arith.constant 5.000000e-01 : f32
    %192 = vector.broadcast %cst_69 : f32 to vector<8x128xf32>
    %193 = arith.mulf %192, %191 : vector<8x128xf32>
    %cst_70 = arith.constant 5.000000e-01 : f32
    %194 = vector.broadcast %cst_70 : f32 to vector<8x128xf32>
    %195 = arith.addf %193, %194 : vector<8x128xf32>
    %196 = arith.mulf %185, %147 : vector<8x128xf32>
    %197 = arith.mulf %177, %187 : vector<8x128xf32>
    %198 = arith.addf %196, %197 : vector<8x128xf32>
    %199 = math.tanh %198 : vector<8x128xf32>
    %200 = arith.mulf %195, %199 : vector<8x128xf32>
    %201 = arith.addi %7, %c3_i32 : i32
    %202 = vector.broadcast %201 : i32 to vector<8x1xi32>
    %203 = arith.cmpi slt, %202, %5 : vector<8x1xi32>
    %204 = vector.broadcast %6 : i1 to vector<8x1xi1>
    %205 = arith.ori %204, %203 : vector<8x1xi1>
    %cst_71 = arith.constant 0.000000e+00 : f32
    %206 = vector.shape_cast %205 : vector<8x1xi1> to vector<8x1xi1>
    %207 = vector.broadcast %206 : vector<8x1xi1> to vector<8x128xi1>
    %208 = vector.broadcast %cst_71 : f32 to vector<8x128xf32>
    %209 = arith.select %207, %200, %208 : vector<8x128xi1>, vector<8x128xf32>
    %210 = arith.index_cast %c3_i32 : i32 to index
    %c0_72 = arith.constant 0 : index
    %c0_73 = arith.constant 0 : index
    %211 = vector.load %arg5[%210, %c0_72, %c0_73] : memref<8x8x128xf32, #tpu.memory_space<vmem>>, vector<1x8x128xf32>
    %212 = vector.shape_cast %211 : vector<1x8x128xf32> to vector<8x128xf32>
    %213 = vector.shape_cast %209 : vector<8x128xf32> to vector<1x8x128xf32>
    tpu.vector_store %arg5[%210, %c0_72, %c0_73], %213 {strides = array<i32>} : memref<8x8x128xf32, #tpu.memory_space<vmem>>, vector<1x8x128xf32>,
    %c4_i32 = arith.constant 4 : i32
    %c0_74 = arith.constant 0 : index
    %214 = arith.index_cast %c4_i32 : i32 to index
    %c0_75 = arith.constant 0 : index
    %c0_76 = arith.constant 0 : index
    %215 = vector.load %arg3[%c0_74, %214, %c0_75, %c0_76] : memref<1x8x8x512xbf16, #tpu.memory_space<vmem>>, vector<1x1x8x512xbf16>
    %216 = vector.shape_cast %215 : vector<1x1x8x512xbf16> to vector<8x512xbf16>
    %217 = arith.extf %216 : vector<8x512xbf16> to vector<8x512xf32>
    %218 = arith.truncf %200 : vector<8x128xf32> to vector<8x128xbf16>
    %cst_77 = arith.constant dense<0.000000e+00> : vector<8x512xf32>
    %219 = tpu.matmul %218, %4, %cst_77 {dimension_numbers = #tpu.dot_dimension_numbers<[1], [0], [0], [1], [0, 0, 1, 1], [], []>} : vector<8x128xbf16>, vector<128x512xbf16>, vector<8x512xf32> -> vector<8x512xf32>
    %220 = arith.addf %217, %219 : vector<8x512xf32>
    %221 = vector.extract_strided_slice %220 {offsets = [0, 0], sizes = [8, 128], strides = [1, 1]} : vector<8x512xf32> to vector<8x128xf32>
    %cst_78 = arith.constant 5.000000e-01 : f32
    %222 = vector.broadcast %cst_78 : f32 to vector<8x128xf32>
    %223 = arith.mulf %222, %221 : vector<8x128xf32>
    %224 = math.tanh %223 : vector<8x128xf32>
    %cst_79 = arith.constant 5.000000e-01 : f32
    %225 = vector.broadcast %cst_79 : f32 to vector<8x128xf32>
    %226 = arith.mulf %225, %224 : vector<8x128xf32>
    %cst_80 = arith.constant 5.000000e-01 : f32
    %227 = vector.broadcast %cst_80 : f32 to vector<8x128xf32>
    %228 = arith.addf %226, %227 : vector<8x128xf32>
    %229 = vector.extract_strided_slice %220 {offsets = [0, 128], sizes = [8, 128], strides = [1, 1]} : vector<8x512xf32> to vector<8x128xf32>
    %cst_81 = arith.constant 5.000000e-01 : f32
    %230 = vector.broadcast %cst_81 : f32 to vector<8x128xf32>
    %231 = arith.mulf %230, %229 : vector<8x128xf32>
    %232 = math.tanh %231 : vector<8x128xf32>
    %cst_82 = arith.constant 5.000000e-01 : f32
    %233 = vector.broadcast %cst_82 : f32 to vector<8x128xf32>
    %234 = arith.mulf %233, %232 : vector<8x128xf32>
    %cst_83 = arith.constant 5.000000e-01 : f32
    %235 = vector.broadcast %cst_83 : f32 to vector<8x128xf32>
    %236 = arith.addf %234, %235 : vector<8x128xf32>
    %237 = vector.extract_strided_slice %220 {offsets = [0, 256], sizes = [8, 128], strides = [1, 1]} : vector<8x512xf32> to vector<8x128xf32>
    %238 = math.tanh %237 : vector<8x128xf32>
    %239 = vector.extract_strided_slice %220 {offsets = [0, 384], sizes = [8, 128], strides = [1, 1]} : vector<8x512xf32> to vector<8x128xf32>
    %cst_84 = arith.constant 5.000000e-01 : f32
    %240 = vector.broadcast %cst_84 : f32 to vector<8x128xf32>
    %241 = arith.mulf %240, %239 : vector<8x128xf32>
    %242 = math.tanh %241 : vector<8x128xf32>
    %cst_85 = arith.constant 5.000000e-01 : f32
    %243 = vector.broadcast %cst_85 : f32 to vector<8x128xf32>
    %244 = arith.mulf %243, %242 : vector<8x128xf32>
    %cst_86 = arith.constant 5.000000e-01 : f32
    %245 = vector.broadcast %cst_86 : f32 to vector<8x128xf32>
    %246 = arith.addf %244, %245 : vector<8x128xf32>
    %247 = arith.mulf %236, %198 : vector<8x128xf32>
    %248 = arith.mulf %228, %238 : vector<8x128xf32>
    %249 = arith.addf %247, %248 : vector<8x128xf32>
    %250 = math.tanh %249 : vector<8x128xf32>
    %251 = arith.mulf %246, %250 : vector<8x128xf32>
    %252 = arith.addi %7, %c4_i32 : i32
    %253 = vector.broadcast %252 : i32 to vector<8x1xi32>
    %254 = arith.cmpi slt, %253, %5 : vector<8x1xi32>
    %255 = vector.broadcast %6 : i1 to vector<8x1xi1>
    %256 = arith.ori %255, %254 : vector<8x1xi1>
    %cst_87 = arith.constant 0.000000e+00 : f32
    %257 = vector.shape_cast %256 : vector<8x1xi1> to vector<8x1xi1>
    %258 = vector.broadcast %257 : vector<8x1xi1> to vector<8x128xi1>
    %259 = vector.broadcast %cst_87 : f32 to vector<8x128xf32>
    %260 = arith.select %258, %251, %259 : vector<8x128xi1>, vector<8x128xf32>
    %261 = arith.index_cast %c4_i32 : i32 to index
    %c0_88 = arith.constant 0 : index
    %c0_89 = arith.constant 0 : index
    %262 = vector.load %arg5[%261, %c0_88, %c0_89] : memref<8x8x128xf32, #tpu.memory_space<vmem>>, vector<1x8x128xf32>
    %263 = vector.shape_cast %262 : vector<1x8x128xf32> to vector<8x128xf32>
    %264 = vector.shape_cast %260 : vector<8x128xf32> to vector<1x8x128xf32>
    tpu.vector_store %arg5[%261, %c0_88, %c0_89], %264 {strides = array<i32>} : memref<8x8x128xf32, #tpu.memory_space<vmem>>, vector<1x8x128xf32>,
    %c5_i32 = arith.constant 5 : i32
    %c0_90 = arith.constant 0 : index
    %265 = arith.index_cast %c5_i32 : i32 to index
    %c0_91 = arith.constant 0 : index
    %c0_92 = arith.constant 0 : index
    %266 = vector.load %arg3[%c0_90, %265, %c0_91, %c0_92] : memref<1x8x8x512xbf16, #tpu.memory_space<vmem>>, vector<1x1x8x512xbf16>
    %267 = vector.shape_cast %266 : vector<1x1x8x512xbf16> to vector<8x512xbf16>
    %268 = arith.extf %267 : vector<8x512xbf16> to vector<8x512xf32>
    %269 = arith.truncf %251 : vector<8x128xf32> to vector<8x128xbf16>
    %cst_93 = arith.constant dense<0.000000e+00> : vector<8x512xf32>
    %270 = tpu.matmul %269, %4, %cst_93 {dimension_numbers = #tpu.dot_dimension_numbers<[1], [0], [0], [1], [0, 0, 1, 1], [], []>} : vector<8x128xbf16>, vector<128x512xbf16>, vector<8x512xf32> -> vector<8x512xf32>
    %271 = arith.addf %268, %270 : vector<8x512xf32>
    %272 = vector.extract_strided_slice %271 {offsets = [0, 0], sizes = [8, 128], strides = [1, 1]} : vector<8x512xf32> to vector<8x128xf32>
    %cst_94 = arith.constant 5.000000e-01 : f32
    %273 = vector.broadcast %cst_94 : f32 to vector<8x128xf32>
    %274 = arith.mulf %273, %272 : vector<8x128xf32>
    %275 = math.tanh %274 : vector<8x128xf32>
    %cst_95 = arith.constant 5.000000e-01 : f32
    %276 = vector.broadcast %cst_95 : f32 to vector<8x128xf32>
    %277 = arith.mulf %276, %275 : vector<8x128xf32>
    %cst_96 = arith.constant 5.000000e-01 : f32
    %278 = vector.broadcast %cst_96 : f32 to vector<8x128xf32>
    %279 = arith.addf %277, %278 : vector<8x128xf32>
    %280 = vector.extract_strided_slice %271 {offsets = [0, 128], sizes = [8, 128], strides = [1, 1]} : vector<8x512xf32> to vector<8x128xf32>
    %cst_97 = arith.constant 5.000000e-01 : f32
    %281 = vector.broadcast %cst_97 : f32 to vector<8x128xf32>
    %282 = arith.mulf %281, %280 : vector<8x128xf32>
    %283 = math.tanh %282 : vector<8x128xf32>
    %cst_98 = arith.constant 5.000000e-01 : f32
    %284 = vector.broadcast %cst_98 : f32 to vector<8x128xf32>
    %285 = arith.mulf %284, %283 : vector<8x128xf32>
    %cst_99 = arith.constant 5.000000e-01 : f32
    %286 = vector.broadcast %cst_99 : f32 to vector<8x128xf32>
    %287 = arith.addf %285, %286 : vector<8x128xf32>
    %288 = vector.extract_strided_slice %271 {offsets = [0, 256], sizes = [8, 128], strides = [1, 1]} : vector<8x512xf32> to vector<8x128xf32>
    %289 = math.tanh %288 : vector<8x128xf32>
    %290 = vector.extract_strided_slice %271 {offsets = [0, 384], sizes = [8, 128], strides = [1, 1]} : vector<8x512xf32> to vector<8x128xf32>
    %cst_100 = arith.constant 5.000000e-01 : f32
    %291 = vector.broadcast %cst_100 : f32 to vector<8x128xf32>
    %292 = arith.mulf %291, %290 : vector<8x128xf32>
    %293 = math.tanh %292 : vector<8x128xf32>
    %cst_101 = arith.constant 5.000000e-01 : f32
    %294 = vector.broadcast %cst_101 : f32 to vector<8x128xf32>
    %295 = arith.mulf %294, %293 : vector<8x128xf32>
    %cst_102 = arith.constant 5.000000e-01 : f32
    %296 = vector.broadcast %cst_102 : f32 to vector<8x128xf32>
    %297 = arith.addf %295, %296 : vector<8x128xf32>
    %298 = arith.mulf %287, %249 : vector<8x128xf32>
    %299 = arith.mulf %279, %289 : vector<8x128xf32>
    %300 = arith.addf %298, %299 : vector<8x128xf32>
    %301 = math.tanh %300 : vector<8x128xf32>
    %302 = arith.mulf %297, %301 : vector<8x128xf32>
    %303 = arith.addi %7, %c5_i32 : i32
    %304 = vector.broadcast %303 : i32 to vector<8x1xi32>
    %305 = arith.cmpi slt, %304, %5 : vector<8x1xi32>
    %306 = vector.broadcast %6 : i1 to vector<8x1xi1>
    %307 = arith.ori %306, %305 : vector<8x1xi1>
    %cst_103 = arith.constant 0.000000e+00 : f32
    %308 = vector.shape_cast %307 : vector<8x1xi1> to vector<8x1xi1>
    %309 = vector.broadcast %308 : vector<8x1xi1> to vector<8x128xi1>
    %310 = vector.broadcast %cst_103 : f32 to vector<8x128xf32>
    %311 = arith.select %309, %302, %310 : vector<8x128xi1>, vector<8x128xf32>
    %312 = arith.index_cast %c5_i32 : i32 to index
    %c0_104 = arith.constant 0 : index
    %c0_105 = arith.constant 0 : index
    %313 = vector.load %arg5[%312, %c0_104, %c0_105] : memref<8x8x128xf32, #tpu.memory_space<vmem>>, vector<1x8x128xf32>
    %314 = vector.shape_cast %313 : vector<1x8x128xf32> to vector<8x128xf32>
    %315 = vector.shape_cast %311 : vector<8x128xf32> to vector<1x8x128xf32>
    tpu.vector_store %arg5[%312, %c0_104, %c0_105], %315 {strides = array<i32>} : memref<8x8x128xf32, #tpu.memory_space<vmem>>, vector<1x8x128xf32>,
    %c6_i32 = arith.constant 6 : i32
    %c0_106 = arith.constant 0 : index
    %316 = arith.index_cast %c6_i32 : i32 to index
    %c0_107 = arith.constant 0 : index
    %c0_108 = arith.constant 0 : index
    %317 = vector.load %arg3[%c0_106, %316, %c0_107, %c0_108] : memref<1x8x8x512xbf16, #tpu.memory_space<vmem>>, vector<1x1x8x512xbf16>
    %318 = vector.shape_cast %317 : vector<1x1x8x512xbf16> to vector<8x512xbf16>
    %319 = arith.extf %318 : vector<8x512xbf16> to vector<8x512xf32>
    %320 = arith.truncf %302 : vector<8x128xf32> to vector<8x128xbf16>
    %cst_109 = arith.constant dense<0.000000e+00> : vector<8x512xf32>
    %321 = tpu.matmul %320, %4, %cst_109 {dimension_numbers = #tpu.dot_dimension_numbers<[1], [0], [0], [1], [0, 0, 1, 1], [], []>} : vector<8x128xbf16>, vector<128x512xbf16>, vector<8x512xf32> -> vector<8x512xf32>
    %322 = arith.addf %319, %321 : vector<8x512xf32>
    %323 = vector.extract_strided_slice %322 {offsets = [0, 0], sizes = [8, 128], strides = [1, 1]} : vector<8x512xf32> to vector<8x128xf32>
    %cst_110 = arith.constant 5.000000e-01 : f32
    %324 = vector.broadcast %cst_110 : f32 to vector<8x128xf32>
    %325 = arith.mulf %324, %323 : vector<8x128xf32>
    %326 = math.tanh %325 : vector<8x128xf32>
    %cst_111 = arith.constant 5.000000e-01 : f32
    %327 = vector.broadcast %cst_111 : f32 to vector<8x128xf32>
    %328 = arith.mulf %327, %326 : vector<8x128xf32>
    %cst_112 = arith.constant 5.000000e-01 : f32
    %329 = vector.broadcast %cst_112 : f32 to vector<8x128xf32>
    %330 = arith.addf %328, %329 : vector<8x128xf32>
    %331 = vector.extract_strided_slice %322 {offsets = [0, 128], sizes = [8, 128], strides = [1, 1]} : vector<8x512xf32> to vector<8x128xf32>
    %cst_113 = arith.constant 5.000000e-01 : f32
    %332 = vector.broadcast %cst_113 : f32 to vector<8x128xf32>
    %333 = arith.mulf %332, %331 : vector<8x128xf32>
    %334 = math.tanh %333 : vector<8x128xf32>
    %cst_114 = arith.constant 5.000000e-01 : f32
    %335 = vector.broadcast %cst_114 : f32 to vector<8x128xf32>
    %336 = arith.mulf %335, %334 : vector<8x128xf32>
    %cst_115 = arith.constant 5.000000e-01 : f32
    %337 = vector.broadcast %cst_115 : f32 to vector<8x128xf32>
    %338 = arith.addf %336, %337 : vector<8x128xf32>
    %339 = vector.extract_strided_slice %322 {offsets = [0, 256], sizes = [8, 128], strides = [1, 1]} : vector<8x512xf32> to vector<8x128xf32>
    %340 = math.tanh %339 : vector<8x128xf32>
    %341 = vector.extract_strided_slice %322 {offsets = [0, 384], sizes = [8, 128], strides = [1, 1]} : vector<8x512xf32> to vector<8x128xf32>
    %cst_116 = arith.constant 5.000000e-01 : f32
    %342 = vector.broadcast %cst_116 : f32 to vector<8x128xf32>
    %343 = arith.mulf %342, %341 : vector<8x128xf32>
    %344 = math.tanh %343 : vector<8x128xf32>
    %cst_117 = arith.constant 5.000000e-01 : f32
    %345 = vector.broadcast %cst_117 : f32 to vector<8x128xf32>
    %346 = arith.mulf %345, %344 : vector<8x128xf32>
    %cst_118 = arith.constant 5.000000e-01 : f32
    %347 = vector.broadcast %cst_118 : f32 to vector<8x128xf32>
    %348 = arith.addf %346, %347 : vector<8x128xf32>
    %349 = arith.mulf %338, %300 : vector<8x128xf32>
    %350 = arith.mulf %330, %340 : vector<8x128xf32>
    %351 = arith.addf %349, %350 : vector<8x128xf32>
    %352 = math.tanh %351 : vector<8x128xf32>
    %353 = arith.mulf %348, %352 : vector<8x128xf32>
    %354 = arith.addi %7, %c6_i32 : i32
    %355 = vector.broadcast %354 : i32 to vector<8x1xi32>
    %356 = arith.cmpi slt, %355, %5 : vector<8x1xi32>
    %357 = vector.broadcast %6 : i1 to vector<8x1xi1>
    %358 = arith.ori %357, %356 : vector<8x1xi1>
    %cst_119 = arith.constant 0.000000e+00 : f32
    %359 = vector.shape_cast %358 : vector<8x1xi1> to vector<8x1xi1>
    %360 = vector.broadcast %359 : vector<8x1xi1> to vector<8x128xi1>
    %361 = vector.broadcast %cst_119 : f32 to vector<8x128xf32>
    %362 = arith.select %360, %353, %361 : vector<8x128xi1>, vector<8x128xf32>
    %363 = arith.index_cast %c6_i32 : i32 to index
    %c0_120 = arith.constant 0 : index
    %c0_121 = arith.constant 0 : index
    %364 = vector.load %arg5[%363, %c0_120, %c0_121] : memref<8x8x128xf32, #tpu.memory_space<vmem>>, vector<1x8x128xf32>
    %365 = vector.shape_cast %364 : vector<1x8x128xf32> to vector<8x128xf32>
    %366 = vector.shape_cast %362 : vector<8x128xf32> to vector<1x8x128xf32>
    tpu.vector_store %arg5[%363, %c0_120, %c0_121], %366 {strides = array<i32>} : memref<8x8x128xf32, #tpu.memory_space<vmem>>, vector<1x8x128xf32>,
    %c7_i32 = arith.constant 7 : i32
    %c0_122 = arith.constant 0 : index
    %367 = arith.index_cast %c7_i32 : i32 to index
    %c0_123 = arith.constant 0 : index
    %c0_124 = arith.constant 0 : index
    %368 = vector.load %arg3[%c0_122, %367, %c0_123, %c0_124] : memref<1x8x8x512xbf16, #tpu.memory_space<vmem>>, vector<1x1x8x512xbf16>
    %369 = vector.shape_cast %368 : vector<1x1x8x512xbf16> to vector<8x512xbf16>
    %370 = arith.extf %369 : vector<8x512xbf16> to vector<8x512xf32>
    %371 = arith.truncf %353 : vector<8x128xf32> to vector<8x128xbf16>
    %cst_125 = arith.constant dense<0.000000e+00> : vector<8x512xf32>
    %372 = tpu.matmul %371, %4, %cst_125 {dimension_numbers = #tpu.dot_dimension_numbers<[1], [0], [0], [1], [0, 0, 1, 1], [], []>} : vector<8x128xbf16>, vector<128x512xbf16>, vector<8x512xf32> -> vector<8x512xf32>
    %373 = arith.addf %370, %372 : vector<8x512xf32>
    %374 = vector.extract_strided_slice %373 {offsets = [0, 0], sizes = [8, 128], strides = [1, 1]} : vector<8x512xf32> to vector<8x128xf32>
    %cst_126 = arith.constant 5.000000e-01 : f32
    %375 = vector.broadcast %cst_126 : f32 to vector<8x128xf32>
    %376 = arith.mulf %375, %374 : vector<8x128xf32>
    %377 = math.tanh %376 : vector<8x128xf32>
    %cst_127 = arith.constant 5.000000e-01 : f32
    %378 = vector.broadcast %cst_127 : f32 to vector<8x128xf32>
    %379 = arith.mulf %378, %377 : vector<8x128xf32>
    %cst_128 = arith.constant 5.000000e-01 : f32
    %380 = vector.broadcast %cst_128 : f32 to vector<8x128xf32>
    %381 = arith.addf %379, %380 : vector<8x128xf32>
    %382 = vector.extract_strided_slice %373 {offsets = [0, 128], sizes = [8, 128], strides = [1, 1]} : vector<8x512xf32> to vector<8x128xf32>
    %cst_129 = arith.constant 5.000000e-01 : f32
    %383 = vector.broadcast %cst_129 : f32 to vector<8x128xf32>
    %384 = arith.mulf %383, %382 : vector<8x128xf32>
    %385 = math.tanh %384 : vector<8x128xf32>
    %cst_130 = arith.constant 5.000000e-01 : f32
    %386 = vector.broadcast %cst_130 : f32 to vector<8x128xf32>
    %387 = arith.mulf %386, %385 : vector<8x128xf32>
    %cst_131 = arith.constant 5.000000e-01 : f32
    %388 = vector.broadcast %cst_131 : f32 to vector<8x128xf32>
    %389 = arith.addf %387, %388 : vector<8x128xf32>
    %390 = vector.extract_strided_slice %373 {offsets = [0, 256], sizes = [8, 128], strides = [1, 1]} : vector<8x512xf32> to vector<8x128xf32>
    %391 = math.tanh %390 : vector<8x128xf32>
    %392 = vector.extract_strided_slice %373 {offsets = [0, 384], sizes = [8, 128], strides = [1, 1]} : vector<8x512xf32> to vector<8x128xf32>
    %cst_132 = arith.constant 5.000000e-01 : f32
    %393 = vector.broadcast %cst_132 : f32 to vector<8x128xf32>
    %394 = arith.mulf %393, %392 : vector<8x128xf32>
    %395 = math.tanh %394 : vector<8x128xf32>
    %cst_133 = arith.constant 5.000000e-01 : f32
    %396 = vector.broadcast %cst_133 : f32 to vector<8x128xf32>
    %397 = arith.mulf %396, %395 : vector<8x128xf32>
    %cst_134 = arith.constant 5.000000e-01 : f32
    %398 = vector.broadcast %cst_134 : f32 to vector<8x128xf32>
    %399 = arith.addf %397, %398 : vector<8x128xf32>
    %400 = arith.mulf %389, %351 : vector<8x128xf32>
    %401 = arith.mulf %381, %391 : vector<8x128xf32>
    %402 = arith.addf %400, %401 : vector<8x128xf32>
    %403 = math.tanh %402 : vector<8x128xf32>
    %404 = arith.mulf %399, %403 : vector<8x128xf32>
    %405 = arith.addi %7, %c7_i32 : i32
    %406 = vector.broadcast %405 : i32 to vector<8x1xi32>
    %407 = arith.cmpi slt, %406, %5 : vector<8x1xi32>
    %408 = vector.broadcast %6 : i1 to vector<8x1xi1>
    %409 = arith.ori %408, %407 : vector<8x1xi1>
    %cst_135 = arith.constant 0.000000e+00 : f32
    %410 = vector.shape_cast %409 : vector<8x1xi1> to vector<8x1xi1>
    %411 = vector.broadcast %410 : vector<8x1xi1> to vector<8x128xi1>
    %412 = vector.broadcast %cst_135 : f32 to vector<8x128xf32>
    %413 = arith.select %411, %404, %412 : vector<8x128xi1>, vector<8x128xf32>
    %414 = arith.index_cast %c7_i32 : i32 to index
    %c0_136 = arith.constant 0 : index
    %c0_137 = arith.constant 0 : index
    %415 = vector.load %arg5[%414, %c0_136, %c0_137] : memref<8x8x128xf32, #tpu.memory_space<vmem>>, vector<1x8x128xf32>
    %416 = vector.shape_cast %415 : vector<1x8x128xf32> to vector<8x128xf32>
    %417 = vector.shape_cast %413 : vector<8x128xf32> to vector<1x8x128xf32>
    tpu.vector_store %arg5[%414, %c0_136, %c0_137], %417 {strides = array<i32>} : memref<8x8x128xf32, #tpu.memory_space<vmem>>, vector<1x8x128xf32>,
    %c8_i32_138 = arith.constant 8 : i32
    %c0_139 = arith.constant 0 : index
    %c0_140 = arith.constant 0 : index
    %418 = vector.load %arg6[%c0_139, %c0_140] : memref<8x128xf32, #tpu.memory_space<vmem>>, vector<8x128xf32>
    tpu.vector_store %arg6[%c0_139, %c0_140], %404 {strides = array<i32>} : memref<8x128xf32, #tpu.memory_space<vmem>>, vector<8x128xf32>,
    %c0_141 = arith.constant 0 : index
    %c0_142 = arith.constant 0 : index
    %419 = vector.load %arg7[%c0_141, %c0_142] : memref<8x128xf32, #tpu.memory_space<vmem>>, vector<8x128xf32>
    tpu.vector_store %arg7[%c0_141, %c0_142], %402 {strides = array<i32>} : memref<8x128xf32, #tpu.memory_space<vmem>>, vector<8x128xf32>,
    return
  }
  func.func @transform_0(%arg0: i32, %arg1: i32) -> (i32, i32) {
    %c0_i32 = arith.constant 0 : i32
    %c0_i32_0 = arith.constant 0 : i32
    %c0_i32_1 = arith.constant 0 : i32
    return %c0_i32, %c0_i32_0 : i32, i32
  }
  func.func @transform_1(%arg0: i32, %arg1: i32) -> (i32, i32, i32, i32) {
    %c0_i32 = arith.constant 0 : i32
    %c0_i32_0 = arith.constant 0 : i32
    %c0_i32_1 = arith.constant 0 : i32
    return %arg0, %arg1, %c0_i32, %c0_i32_0 : i32, i32, i32, i32
  }
  func.func @transform_2(%arg0: i32, %arg1: i32) -> (i32, i32, i32) {
    %c0_i32 = arith.constant 0 : i32
    %c0_i32_0 = arith.constant 0 : i32
    %c0_i32_1 = arith.constant 0 : i32
    return %arg0, %c0_i32, %c0_i32_0 : i32, i32, i32
  }
  func.func @transform_3(%arg0: i32, %arg1: i32) -> (i32, i32, i32) {
    %c0_i32 = arith.constant 0 : i32
    %c0_i32_0 = arith.constant 0 : i32
    return %arg1, %c0_i32, %arg0 : i32, i32, i32
  }
}

</mosaic_0001>

<bundles_post_ra>
// kernel: tpu_custom_call.1
= control target key start
LH: loop header
LB: loop body
LE: loop exit
PB: predicated region body
PF: predicated region fallthrough
CT: control target
= control target key end

     0   :  { %8 = vsyncpa [#allocation5], 0  ;;  %s2809_s0 = inlined_call_operand.vmem [shape: s32[8,1], index: 0, kind: input, shape index: {}]   ;;  %s2810_s1 = inlined_call_operand.hbm [shape: bf16[2,8,8,512], index: 1, kind: input, shape index: {}]   ;;  %s2811_s2 = inlined_call_operand.hbm [shape: bf16[2,128,512], index: 2, kind: input, shape index: {}]   ;;  %s2812_s3 = inlined_call_operand.hbm [shape: f32[8,8,256], index: 3, kind: output, shape index: {}]  }
   0x1   :  { %10 = vsyncpa [#allocation5 + $0x1], 0 }
   0x2   :  { %11 = vsyncpa [#allocation8], 0 }
   0x3   :  { %13 = vsyncpa [#allocation8 + $0x1], 0 }
   0x4   :  { %14 = vsyncpa [#allocation6], 0 }
   0x5   :  { %16 = vsyncpa [#allocation6 + $0x1], 0  ;;  %s2069_s12 = smov 0   ;;  %s2071_s13 = smov 0  }
   0x6   :  { %s2073_s14 = smov 0   ;;  %s2075_s15 = smov 0  }
   0x7   :  { %s2077_s16 = smov 0   ;;  %s2079_s17 = smov 0  }
   0x8 LB: > { %s1573_s18 = sadd.s32 4294967295, %s2037_s17   ;;  %s1574_s19 = sadd.s32 4294967294, %s2037_s17   ;;  %s2037_s17 = sphi %s2079_s17, %s22_s17   ;;  %s2033_s16 = sphi %s2077_s16, %s2832_s16   ;;  %s2029_s15 = sphi %s2075_s15, %s2831_s15   ;;  %s2025_s14 = sphi %s2073_s14, %s2830_s14   ;;  %s2021_s13 = sphi %s2071_s13, %s2829_s13   ;;  %s2017_s12 = sphi %s2069_s12, %s2828_s12  }
   0x9   : > { %s34_s20 = sadd.s32 1, %s2033_s16  ;;  %s64_s21 = sadd.s32 1, %s2025_s14 }
   0xa   : > { %p36_p0 = scmp.ge.s32.totalorder %s34_s20, 2  ;;  %p71_p1 = scmp.ne.s32.totalorder %s2025_s14, %s2021_s13 }
   0xb   : > { %p72_p2 = scmp.eq.s32.totalorder %s2037_s17, 0  ;;  %p77_p3 = scmp.ne.s32.totalorder %s2021_s13, %s2017_s12 }
   0xc   : > { %s2834_s20 = smov (%p36_p0, %s34_s20), 0  ;;  %p78_p5 = scmp.eq.s32.totalorder %s1573_s18, 0 }
   0xd   : > { %p2110_p4 = por %p72_p2, %p71_p1  ;;  %s59_s23 = ssub.s32 %s2033_s16, %s2834_s20 }
   0xe   : > { %p129_p6 = scmp.eq.s32.totalorder %s1573_s18, 1  ;;  %p62_p7 = scmp.eq.s32.totalorder %s59_s23, 0 }
   0xf   : > { %p2116_p8 = por %p78_p5, %p77_p3  ;;  %p135_p10 = scmp.eq.s32.totalorder %s1574_s19, 1 }
  0x10   : > { %p2120_p9 = por %p129_p6, %p71_p1  ;;  %p1671_p13 = scmp.lt.s32.totalorder %s2037_s17, 2 }
  0x11   : > { %s2816_s24 = scalar_select %p2116_p8, 1, 0 }
  0x12   : > { %s2817_s25 = scalar_select %p2120_p9, 1, 0 }
  0x13   : > { %s2125_s26 = scalar_select %p62_p7, %s2025_s14, %s64_s21  }
  0x14   : > { %p2127_p11 = por %p135_p10, %p77_p3  ;;  %s2134_s28 = sand.u32 1, %s2025_s14  }
  0x15   : > { %s1577_s29 = sshll.u32 %s2134_s28, 7  ;;  %s1652_s30 = sshll.u32 %s2033_s16, 11 }
  0x16   : > { %s2818_s27 = scalar_select %p2127_p11, 1, 0 }
  0x17   : > { %s2141_s6 = scalar_lea.hbm %s2810_s1, %s1652_s30  ;;  %s162_s7 = scalar_lea.vmem [#allocation4], %s1577_s29 }
  0x18   : > { %s172_s8 = sshll.u32 %s162_s7, 4  ;;  %p2147_p0 = pnand %p1671_p13, %p2110_p4  ;;  %s2143_s8 = int_to_ptr.vmem [resolvable:$true] %s172_s8 }
  0x19   : > { %s159_s10 = scalar_lea.sflag [#allocation5], %s2134_s28  ;;  %s1891_s11 = scalar_lea.hbm %s2141_s6, 2048 }
  0x1a   : > { %p1892_p2 = scmp.ne.s32.totalorder %s2141_s6, %s1891_s11  ;;  %p1893_p3 = pneg %p2147_p0 }
  0x1b   : > { %s1896_s21 = scalar_lea.hbm %s2810_s1, 4096  ;;  %p1897_p4 = scmp.lt.u32.totalorder %s2141_s6, %s2810_s1 }
  0x1c   : > { %p1894_p5 = pnand %p1893_p3, %p1892_p2  ;;  %p1898_p7 = scmp.lt.u32.totalorder %s1896_s21, %s1891_s11 }
  0x1d   : > { %p1900_p13 = scmp.lt.u32.totalorder %s1891_s11, %s2141_s6 }
  0x1e   : > { %p1895_p6 = pneg %p1894_p5  ;;  %p1899_p10 = por %p1898_p7, %p1897_p4 }
  0x20   : > { %p1901_p12 = por %p1900_p13, %p1899_p10 }
  0x22   : > { %p1902_p1 = pnand %p1901_p12, %p1895_p6 }
  0x24   : > { %1905 = shalt.err (!%p1902_p1)
}
  0x25   : > { %s1906_s29 = scalar_lea.vmem %s2143_s8, 2048  ;;  %s2039_s30 = smov [#allocation4]  }
  0x26   : > { %p1907_p2 = scmp.ne.s32.totalorder %s2143_s8, %s1906_s29  ;;  %s1911_s4 = sshll.u32 %s2039_s30, 4  ;;  %s1912_s4 = int_to_ptr.vmem [resolvable:$false] %s1911_s4 }
  0x27   : > { %s1913_s5 = scalar_lea.vmem %s1912_s4, 4096  ;;  %p1914_p9 = scmp.lt.s32.totalorder %s2143_s8, %s1912_s4 }
  0x28   : > { %p1909_p5 = pnand %p1907_p2, %p1893_p3  ;;  %p1915_p4 = scmp.lt.s32.totalorder %s1913_s5, %s1906_s29 }
  0x2a   : > { %p1910_p11 = pneg %p1909_p5  ;;  %p1916_p7 = por %p1915_p4, %p1914_p9 }
  0x2c   : > { %p1917_p10 = pnand %p1916_p7, %p1910_p11 }
  0x2e   : > { %1920 = shalt.err (!%p1917_p10)
}
  0x2f   : > { %s2040_s7 = smov 256   ;;  %s2041_s11 = smov 16  }
  0x30   : > { %1663 = dma.hbm_to_vmem [thread:$0]  (!%p2147_p0), %s2141_s6, 2048, %s2143_s8, %s159_s10, %s2040_s7, %s2040_s7, %s2041_s11  }
  0x31   : > { %p201_p9 = scmp.lt.s32.totalorder %s2037_s17, 3  ;;  %s1580_s18 = sshll.u32 %s2134_s28, 8 }
  0x32   : > { %s1653_s19 = sshll.u32 %s2033_s16, 12  ;;  %p2820_p11 = scmp.ge.s32.totalorder %s2037_s17, 1 }
  0x33   : > { %s2195_s29 = scalar_lea.hbm %s2811_s2, %s1653_s19  ;;  %s186_s30 = scalar_lea.vmem [#allocation7], %s1580_s18 }
  0x34   : > { %p2188_p12 = pnand %p2820_p11, %p201_p9  ;;  %s193_s4 = sshll.u32 %s186_s30, 4  ;;  %s2197_s4 = int_to_ptr.vmem [resolvable:$true] %s193_s4 }
  0x35   : > { %s183_s6 = scalar_lea.sflag [#allocation8], %s2134_s28  ;;  %s1921_s8 = scalar_lea.hbm %s2195_s29, 4096 }
  0x36   : > { %p1922_p1 = scmp.ne.s32.totalorder %s2195_s29, %s1921_s8  ;;  %s1926_s19 = scalar_lea.hbm %s2811_s2, 8192 }
  0x37   : > { %p1927_p2 = scmp.lt.u32.totalorder %s2195_s29, %s2811_s2  ;;  %p1928_p5 = scmp.lt.u32.totalorder %s1926_s19, %s1921_s8 }
  0x38   : > { %p1924_p6 = pnand %p1922_p1, %p1893_p3  ;;  %p1930_p7 = scmp.lt.u32.totalorder %s1921_s8, %s2195_s29 }
  0x39   : > { %p1929_p4 = por %p1928_p5, %p1927_p2 }
  0x3a   : > { %p1925_p13 = pneg %p1924_p6 }
  0x3b   : > { %p1931_p10 = por %p1930_p7, %p1929_p4 }
  0x3d   : > { %p1932_p9 = pnand %p1931_p10, %p1925_p13 }
  0x3f   : > { %1935 = shalt.err (!%p1932_p9)
}
  0x40   : > { %s1936_s18 = scalar_lea.vmem %s2197_s4, 4096  ;;  %s2042_s30 = smov [#allocation7]  }
  0x41   : > { %p1937_p11 = scmp.ne.s32.totalorder %s2197_s4, %s1936_s18  ;;  %s1941_s10 = sshll.u32 %s2042_s30, 4  ;;  %s1942_s10 = int_to_ptr.vmem [resolvable:$false] %s1941_s10 }
  0x42   : > { %s1943_s5 = scalar_lea.vmem %s1942_s10, 8192  ;;  %p1944_p8 = scmp.lt.s32.totalorder %s2197_s4, %s1942_s10 }
  0x43   : > { %p1939_p1 = pnand %p1937_p11, %p1893_p3  ;;  %p1945_p2 = scmp.lt.s32.totalorder %s1943_s5, %s1936_s18 }
  0x45   : > { %p1940_p6 = pneg %p1939_p1  ;;  %p1946_p5 = por %p1945_p2, %p1944_p8 }
  0x47   : > { %p1947_p4 = pnand %p1946_p5, %p1940_p6 }
  0x49   : > { %1950 = shalt.err (!%p1947_p4)
}
  0x4a   : > { %1666 = dma.hbm_to_vmem [thread:$0]  (!%p2147_p0), %s2195_s29, 4096, %s2197_s4, %s183_s6, %s2040_s7, %s2040_s7, %s2041_s11  }
  0x4b   : > { %205 = sbr.rel (%p2188_p12) target bundleno = 2144 (0x860), region = 32  ;;  %s2231_s8 = sand.u32 (!%p2188_p12), 1, %s2021_s13  }
  0x4c   : > { %s1584_s19 = sshll.u32 (!%p2188_p12), %s2231_s8, 7  ;;  %s208_s22 = scalar_lea.sflag (!%p2188_p12), [#allocation5], %s2231_s8 }
  0x4d   : > { %s2235_s9 = scalar_lea.vmem (!%p2188_p12), [#allocation4], %s1584_s19  ;;  %p2822_p8 = scmp.ne.s32.totalorder (!%p2188_p12), %s2816_s24, 0 }
  0x52   : > { %2004 = dma.done.wait (%p2822_p8), %s208_s22, 2048  }
  0x53   : > { %2006 = vsyncadd (%p2822_p8), %s208_s22, 4294965248  ;;  %s1585_s28 = sshll.u32 %s2231_s8, 8  ;;  %s217_s7 = scalar_lea.sflag [#allocation8], %s2231_s8 }
  0x54   : > { %s2243_s11 = scalar_lea.vmem [#allocation7], %s1585_s28 }
  0x55   : > { %2008 = dma.done.wait (%p2822_p8), %s217_s7, 4096  }
  0x56   : > { %2010 = vsyncadd (%p2822_p8), %s217_s7, 4294963200  ;;  %v2043_v0 = vmov 0   ;;  %v2254_v1 = vld [vmem:[%s2243_s11 + $0x4] ss:$16 sps:$4 sm:$0xff]   ;;  %v2257_v2 = vld [vmem:[%s2243_s11] ss:$16 sps:$4 sm:$0xff]  }
  0x57   : > { %493 = vmatprep.mubr.bf16.mxu0 %v2043_v0  ;;  %534 = vmatprep.mubr.bf16.mxu1 %v2043_v0  ;;  %v2261_v3 = vld [vmem:[%s2243_s11 + $0x24] ss:$16 sps:$4 sm:$0xff]   ;;  %v2265_v4 = vld [vmem:[%s2243_s11 + $0xc] ss:$16 sps:$4 sm:$0xff]   ;;  %v2268_v5 = vld [vmem:[%s2243_s11 + $0x20] ss:$16 sps:$4 sm:$0xff]  }
  0x58   : > { %1728 = vset.pattern.permute.xlu0 %v2043_v0  ;;  %1729 = vset.pattern.permute.xlu1 %v2043_v0  ;;  %v2271_v6 = vld [vmem:[%s2243_s11 + $0x8] ss:$16 sps:$4 sm:$0xff]   ;;  %v2275_v7 = vld [vmem:[%s2243_s11 + $0x44] ss:$16 sps:$4 sm:$0xff]   ;;  %v2279_v8 = vld [vmem:[%s2243_s11 + $0x2c] ss:$16 sps:$4 sm:$0xff]  }
  0x59   : > { %461 = vmatprep.subr.bf16.mxu0 %v2254_v1  ;;  %502 = vmatprep.subr.bf16.mxu1 %v2265_v4  ;;  %v2283_v9 = vld [vmem:[%s2243_s11 + $0x28] ss:$16 sps:$4 sm:$0xff]   ;;  %v2288_v10 = vld [vmem:[%s2243_s11 + $0x40] ss:$16 sps:$4 sm:$0xff]   ;;  %v2292_v11 = vld [vmem:[%s2243_s11 + $0x64] ss:$16 sps:$4 sm:$0xff]  }
  0x5a   : > { %462 = vmatpush1.bf16.msra.mxu0 %v2257_v2  ;;  %503 = vmatpush1.bf16.msra.mxu1 %v2271_v6  ;;  %v2295_v12 = vld [vmem:[%s2243_s11 + $0x4c] ss:$16 sps:$4 sm:$0xff]   ;;  %p290_p0 = scmp.eq.s32.totalorder %s2029_s15, 1  ;;  %v2300_v13 = vld [vmem:[%s2243_s11 + $0x48] ss:$16 sps:$4 sm:$0xff]   ;;  %v2044_v37 = vmov 0.0|0.0  }
  0x5b   : > { %463 = vmatprep.subr.bf16.mxu0 %v2261_v3  ;;  %504 = vmatprep.subr.bf16.mxu1 %v2279_v8  ;;  %v2305_v14 = vld [vmem:[%s2243_s11 + $0x60] ss:$16 sps:$4 sm:$0xff]   ;;  %v2308_v15 = vld [vmem:[%s2243_s11 + $0x6c] ss:$16 sps:$4 sm:$0xff]   ;;  %v2312_v16 = vld [vmem:[%s2243_s11 + $0x84] ss:$16 sps:$4 sm:$0xff]  }
  0x5c   : > { %s567_s24 = scalar_select %p290_p0, 1, 0  ;;  %v2316_v17 = vld [vmem:[%s2243_s11 + $0x80] ss:$16 sps:$4 sm:$0xff]   ;;  %v2319_v18 = vld [vmem:[%s2243_s11 + $0x68] ss:$16 sps:$4 sm:$0xff]  }
  0x5d   : > { %v2324_v19 = vld [vmem:[%s2243_s11 + $0x8c] ss:$16 sps:$4 sm:$0xff]   ;;  %v2328_v20 = vld [vmem:[%s2243_s11 + $0xa4] ss:$16 sps:$4 sm:$0xff]   ;;  %v2332_v22 = vld [vmem:[%s2243_s11 + $0x88] ss:$16 sps:$4 sm:$0xff]  }
  0x5e   : > { %464 = vmatpush1.bf16.msra.mxu0 %v2268_v5  ;;  %505 = vmatpush1.bf16.msra.mxu1 %v2283_v9  ;;  %v568_v21 = vstv %s567_s24  ;;  %v2337_v23 = vld [vmem:[%s2243_s11 + $0xa0] ss:$16 sps:$4 sm:$0xff]   ;;  %v2340_v24 = vld [vmem:[%s2243_s11 + $0xac] ss:$16 sps:$4 sm:$0xff]   ;;  %v2344_v25 = vld [vmem:[%s2243_s11 + $0xc4] ss:$16 sps:$4 sm:$0xff]  }
  0x5f   : > { %465 = vmatprep.subr.bf16.mxu0 %v2275_v7  ;;  %506 = vmatprep.subr.bf16.mxu1 %v2295_v12  ;;  %vm2346_vm0 = vcmp.eq.s32.totalorder %v568_v21, 1  ;;  %v2353_v27 = vld [vmem:[%s2809_s0] sm:$0xff]  ;;  %v2363_v29 = vld [vmem:[%s2243_s11 + $0xc0] ss:$16 sps:$4 sm:$0xff]   ;;  %v2372_v31 = vld [vmem:[%s2243_s11 + $0xe4] ss:$16 sps:$4 sm:$0xff]  }
  0x60   : > { %v2357_v28 = vld [vmem:[%s2243_s11 + $0xa8] ss:$16 sps:$4 sm:$0xff]   ;;  %vm1619_vm1 = vcmp.gt.s32.totalorder %v2353_v27, 0  ;;  %v2366_v30 = vld [vmem:[%s2243_s11 + $0xcc] ss:$16 sps:$4 sm:$0xff]   ;;  %vm1622_vm3 = vcmp.gt.s32.totalorder %v2353_v27, 1 }
  0x61   : > { %vm570_vm2 = vmor %vm2346_vm0, %vm1619_vm1  ;;  %v2377_v33 = vld [vmem:[%s2243_s11 + $0xc8] ss:$16 sps:$4 sm:$0xff]   ;;  %v2382_v34 = vld [vmem:[%s2243_s11 + $0xe0] ss:$16 sps:$4 sm:$0xff]   ;;  %s1586_s4 = sshll.u32 %s2231_s8, 6  ;;  %vm1626_vm6 = vcmp.gt.s32.totalorder %v2353_v27, 2 }
  0x62   : > { %466 = vmatpush1.bf16.msra.mxu0 %v2288_v10  ;;  %507 = vmatpush1.bf16.msra.mxu1 %v2300_v13  ;;  %v571_v32 = vsel %vm570_vm2, 1, %v2043_v0  ;;  %v2385_v35 = vld [vmem:[%s2243_s11 + $0xec] ss:$16 sps:$4 sm:$0xff]   ;;  %v2390_v36 = vld [vmem:[%s2243_s11 + $0xe8] ss:$16 sps:$4 sm:$0xff]   ;;  %vm693_vm4 = vmor %vm2346_vm0, %vm1622_vm3  ;;  %s2441_s6 = scalar_lea.vmem [#allocation9], %s1586_s4 }
  0x63   : > { %467 = vmatprep.subr.bf16.mxu0 %v2292_v11  ;;  %508 = vmatprep.subr.bf16.mxu1 %v2308_v15  ;;  %v694_v38 = vsel %vm693_vm4, 1, %v2043_v0  ;;  %v294_v39 = vld [vmem:[%s2235_s9] sm:$0xff]  ;;  %v295_v41 = vld [vmem:[%s2235_s9 + $0x8] sm:$0xff]  ;;  %vm817_vm7 = vmor %vm2346_vm0, %vm1626_vm6  ;;  %vm1630_vm9 = vcmp.gt.s32.totalorder %v2353_v27, 3  ;;  %vm1634_vm12 = vcmp.gt.s32.totalorder %v2353_v27, 4  ;;  %vm1638_vm15 = vcmp.gt.s32.totalorder %v2353_v27, 5 }
  0x64   : > { %573 = vperm.xlu0 %1728, %v571_v32   ;;  %v296_v40 = vunpack.c.l.bf16 %v294_v39  ;;  %v297_v42 = vunpack.c.h.bf16 %v294_v39  ;;  %v298_v44 = vunpack.c.l.bf16 %v295_v41  ;;  %v299_v55 = vunpack.c.h.bf16 %v295_v41  ;;  %vm941_vm10 = vmor %vm2346_vm0, %vm1630_vm9  ;;  %s1464_s30 = sshll.u32 %s2441_s6, 4  ;;  %s1649_s10 = sshll.u32 %s2029_s15, 7  ;;  %s2754_s30 = int_to_ptr.vmem [resolvable:$true] %s1464_s30 }
  0x65   : > { %vm1065_vm13 = vmor %vm2346_vm0, %vm1634_vm12  ;;  %vm1642_vm3 = vcmp.gt.s32.totalorder %v2353_v27, 6  ;;  %s2759_s22 = scalar_lea.hbm %s2812_s3, %s1649_s10  ;;  %s1951_s28 = scalar_lea.vmem %s2754_s30, 1024 }
  0x66   : > { %468 = vmatpush1.bf16.msra.mxu0 %v2305_v14  ;;  %509 = vmatpush1.bf16.msra.mxu1 %v2319_v18  ;;  %vm1189_vm1 = vmor %vm2346_vm0, %vm1638_vm15  ;;  %p1952_p3 = scmp.ne.s32.totalorder %s2754_s30, %s1951_s28  ;;  %p2825_p12 = scmp.ne.s32.totalorder %s2817_s25, 0 }
  0x67   : > { %469 = vmatprep.subr.bf16.mxu0 %v2312_v16  ;;  %510 = vmatprep.subr.bf16.mxu1 %v2324_v19  ;;  %vm1313_vm4 = vmor %vm2346_vm0, %vm1642_vm3  ;;  %s2045_s15 = smov [#allocation9]  }
  0x68   : > { %696 = vperm.xlu0 %1728, %v694_v38   ;;  %p1953_p13 = pnand %p1952_p3, %p2825_p12  ;;  %s1955_s7 = sshll.u32 %s2045_s15, 4  ;;  %s1956_s7 = int_to_ptr.vmem [resolvable:$false] %s1955_s7 }
  0x69   : > { %p1958_p10 = scmp.lt.s32.totalorder %s2754_s30, %s1956_s7 }
  0x6a   : > { %470 = vmatpush1.bf16.msra.mxu0 %v2316_v17  ;;  %511 = vmatpush1.bf16.msra.mxu1 %v2332_v22  ;;  %p1954_p7 = pneg %p1953_p13 }
  0x6b   : > { %471 = vmatprep.subr.bf16.mxu0 %v2328_v20  ;;  %512 = vmatprep.subr.bf16.mxu1 %v2340_v24 }
  0x6e   : > { %472 = vmatpush1.bf16.msra.mxu0 %v2337_v23  ;;  %513 = vmatpush1.bf16.msra.mxu1 %v2357_v28 }
  0x6f   : > { %473 = vmatprep.subr.bf16.mxu0 %v2344_v25  ;;  %514 = vmatprep.subr.bf16.mxu1 %v2366_v30 }
  0x72   : > { %474 = vmatpush1.bf16.msra.mxu0 %v2363_v29  ;;  %515 = vmatpush1.bf16.msra.mxu1 %v2377_v33 }
  0x73   : > { %475 = vmatprep.subr.bf16.mxu0 %v2372_v31  ;;  %516 = vmatprep.subr.bf16.mxu1 %v2385_v35 }
  0x76   : > { %476 = vmatpush1.bf16.msra.mxu0 %v2382_v34  ;;  %517 = vmatpush1.bf16.msra.mxu1 %v2390_v36 }
  0x77   : > { %586 = vmatprep.subr.bf16.mxu0 %v2254_v1  ;;  %627 = vmatprep.subr.bf16.mxu1 %v2265_v4 }
  0x79   : > { %494 = vmatmul.mubr.bf16.vlgmr.msra.gmra.mrb[0].mxu0 %v2044_v37  ;;  %535 = vmatmul.mubr.bf16.vlgmr.msra.gmra.mrb[0].mxu1 %v2044_v37 }
  0x7a   : > { %587 = vmatpush1.bf16.msra.mxu0 %v2257_v2  ;;  %618 = vmatprep.mubr.bf16.mxu0 %v2043_v0 }
  0x7b   : > { %588 = vmatprep.subr.bf16.mxu0 %v2261_v3  ;;  %628 = vmatpush1.bf16.msra.mxu1 %v2271_v6 }
  0x7c   : > { %659 = vmatprep.mubr.bf16.mxu1 %v2043_v0  ;;  %629 = vmatprep.subr.bf16.mxu1 %v2279_v8 }
  0x7e   : > { %589 = vmatpush1.bf16.msra.mxu0 %v2268_v5 }
  0x7f   : > { %590 = vmatprep.subr.bf16.mxu0 %v2275_v7  ;;  %630 = vmatpush1.bf16.msra.mxu1 %v2283_v9 }
  0x80   : > { %631 = vmatprep.subr.bf16.mxu1 %v2295_v12 }
  0x82   : > { %591 = vmatpush1.bf16.msra.mxu0 %v2288_v10 }
  0x83   : > { %592 = vmatprep.subr.bf16.mxu0 %v2292_v11  ;;  %632 = vmatpush1.bf16.msra.mxu1 %v2300_v13 }
  0x84   : > { %633 = vmatprep.subr.bf16.mxu1 %v2308_v15 }
  0x86   : > { %593 = vmatpush1.bf16.msra.mxu0 %v2305_v14 }
  0x87   : > { %594 = vmatprep.subr.bf16.mxu0 %v2312_v16  ;;  %634 = vmatpush1.bf16.msra.mxu1 %v2319_v18 }
  0x88   : > { %635 = vmatprep.subr.bf16.mxu1 %v2324_v19 }
  0x8a   : > { %595 = vmatpush1.bf16.msra.mxu0 %v2316_v17 }
  0x8b   : > { %596 = vmatprep.subr.bf16.mxu0 %v2328_v20  ;;  %636 = vmatpush1.bf16.msra.mxu1 %v2332_v22 }
  0x8c   : > { %637 = vmatprep.subr.bf16.mxu1 %v2340_v24 }
  0x8e   : > { %597 = vmatpush1.bf16.msra.mxu0 %v2337_v23 }
  0x8f   : > { %598 = vmatprep.subr.bf16.mxu0 %v2344_v25  ;;  %638 = vmatpush1.bf16.msra.mxu1 %v2357_v28 }
  0x90   : > { %639 = vmatprep.subr.bf16.mxu1 %v2366_v30 }
  0x92   : > { %599 = vmatpush1.bf16.msra.mxu0 %v2363_v29 }
  0x93   : > { %600 = vmatprep.subr.bf16.mxu0 %v2372_v31  ;;  %640 = vmatpush1.bf16.msra.mxu1 %v2377_v33 }
  0x94   : > { %641 = vmatprep.subr.bf16.mxu1 %v2385_v35 }
  0x96   : > { %601 = vmatpush1.bf16.msra.mxu0 %v2382_v34 }
  0x97   : > { %710 = vmatprep.subr.bf16.mxu0 %v2254_v1  ;;  %642 = vmatpush1.bf16.msra.mxu1 %v2390_v36 }
  0x98   : > { %751 = vmatprep.subr.bf16.mxu1 %v2265_v4 }
 0x14c   : > { %v495_v43 = vpop.f32.mrb[0].mxu0  ;;  %v536_v51 = vpop.f32.mrb[0].mxu1 }
 0x14d   : > { %v543_v45 = vadd.f32 %v495_v43, %v296_v40  ;;  %v497_v46 = vpop.f32.mrb[1].mxu0  ;;  %v545_v53 = vadd.f32 %v536_v51, %v298_v44  ;;  %v538_v54 = vpop.f32.mrb[1].mxu1 }
 0x14e   : > { %v544_v47 = vadd.f32 %v497_v46, %v297_v42  ;;  %v499_v48 = vpop.f32.mrb[2].mxu0  ;;  %v540_v56 = vpop.f32.mrb[2].mxu1  ;;  %v546_v58 = vadd.f32 %v538_v54, %v299_v55 }
 0x14f   : > { %v547_v49 = vmul.f32 0.5, %v543_v45  ;;  %v500_v50 = vpop.f32.mrb[3].mxu0  ;;  %v541_v57 = vpop.f32.mrb[3].mxu1 }
 0x150   : > { %v551_v52 = vmul.f32 0.5, %v544_v47  ;;  %v556_v59 = vmul.f32 0.5, %v546_v58  ;;  %v574_v43 = vpop.permute.xlu0 %573  ;;  %v1620_v50 = vld [vmem:[%s2235_s9 + $0x10] sm:$0xff] }
 0x151   : > { %1778 = vtanh.f32 %v547_v49  ;;  %vm575_vm5 = vcmp.eq.s32.totalorder %v574_v43, 1  ;;  %v818_v49 = vsel %vm817_vm7, 1, %v2043_v0  ;;  %v581_v51 = vunpack.c.l.bf16 %v1620_v50 }
 0x152   : > { %1780 = vtanh.f32 %v551_v52  ;;  %820 = vperm.xlu1 %1729, %v818_v49   ;;  %v1621_v52 = vld [vmem:[%s2235_s9 + $0x18] sm:$0xff] }
 0x153   : > { %1782 = vtanh.f32 %v545_v53  ;;  %v582_v53 = vunpack.c.h.bf16 %v1620_v50  ;;  %v583_v57 = vunpack.c.l.bf16 %v1621_v52 }
 0x154   : > { %1784 = vtanh.f32 %v556_v59 }
 0x15b   : > { %v1779_v60 = vpop.eup %1778 }
 0x15c   : > { %v1781_v61 = vpop.eup %1780  ;;  %v549_v62 = vmul.f32 0.5, %v1779_v60 }
 0x15d   : > { %v1783_v63 = vpop.eup %1782  ;;  %v553_v21 = vmul.f32 0.5, %v1781_v61 }
 0x15e   : > { %v550_v32 = vadd.f32 0.5, %v549_v62  ;;  %v1785_v41 = vpop.eup %1784 }
 0x15f   : > { %v554_v37 = vadd.f32 0.5, %v553_v21  ;;  %v558_v42 = vmul.f32 0.5, %v1785_v41 }
 0x160   : > { %v561_v38 = vmul.f32 %v1783_v63, %v550_v32 }
 0x161   : > { %v560_v39 = vmul.f32 0.0, %v554_v37  ;;  %v559_v44 = vadd.f32 0.5, %v558_v42 }
 0x163   : > { %v2437_v40 = vadd.f32 %v561_v38, %v560_v39  ;;  %v584_v39 = vunpack.c.h.bf16 %v1621_v52 }
 0x165   : > { %1786 = vtanh.f32 %v2437_v40 }
 0x16f   : > { %v1787_v45 = vpop.eup %1786 }
 0x170   : > { %v564_v46 = vmul.f32 %v1787_v45, %v559_v44 }
 0x172   : > { %v576_v47 = vsel %vm575_vm5, %v564_v46, 0.0  ;;  %v585_v48 = vpack.c.bf16 %v564_v46, %v564_v46 }
 0x173   : > { %577 = vst [vmem:[%s2441_s6] sm:$0xff] %v576_v47 }
 0x174   : > { %619 = vmatmul.mubr.bf16.vlgmr.msra.gmra.mrb[4].mxu0 %v585_v48  ;;  %660 = vmatmul.mubr.bf16.vlgmr.msra.gmra.mrb[4].mxu1 %v585_v48 }
 0x175   : > { %711 = vmatpush1.bf16.msra.mxu0 %v2257_v2  ;;  %752 = vmatpush1.bf16.msra.mxu1 %v2271_v6 }
 0x176   : > { %712 = vmatprep.subr.bf16.mxu0 %v2261_v3  ;;  %753 = vmatprep.subr.bf16.mxu1 %v2279_v8 }
 0x177   : > { %742 = vmatprep.mubr.bf16.mxu0 %v2043_v0  ;;  %783 = vmatprep.mubr.bf16.mxu1 %v2043_v0 }
 0x179   : > { %713 = vmatpush1.bf16.msra.mxu0 %v2268_v5  ;;  %754 = vmatpush1.bf16.msra.mxu1 %v2283_v9 }
 0x17a   : > { %714 = vmatprep.subr.bf16.mxu0 %v2275_v7  ;;  %755 = vmatprep.subr.bf16.mxu1 %v2295_v12 }
 0x17d   : > { %715 = vmatpush1.bf16.msra.mxu0 %v2288_v10  ;;  %756 = vmatpush1.bf16.msra.mxu1 %v2300_v13 }
 0x17e   : > { %716 = vmatprep.subr.bf16.mxu0 %v2292_v11  ;;  %757 = vmatprep.subr.bf16.mxu1 %v2308_v15 }
 0x181   : > { %717 = vmatpush1.bf16.msra.mxu0 %v2305_v14  ;;  %758 = vmatpush1.bf16.msra.mxu1 %v2319_v18 }
 0x182   : > { %718 = vmatprep.subr.bf16.mxu0 %v2312_v16  ;;  %759 = vmatprep.subr.bf16.mxu1 %v2324_v19 }
 0x185   : > { %719 = vmatpush1.bf16.msra.mxu0 %v2316_v17  ;;  %760 = vmatpush1.bf16.msra.mxu1 %v2332_v22 }
 0x186   : > { %720 = vmatprep.subr.bf16.mxu0 %v2328_v20  ;;  %761 = vmatprep.subr.bf16.mxu1 %v2340_v24 }
 0x189   : > { %721 = vmatpush1.bf16.msra.mxu0 %v2337_v23  ;;  %762 = vmatpush1.bf16.msra.mxu1 %v2357_v28 }
 0x18a   : > { %722 = vmatprep.subr.bf16.mxu0 %v2344_v25  ;;  %763 = vmatprep.subr.bf16.mxu1 %v2366_v30 }
 0x18d   : > { %723 = vmatpush1.bf16.msra.mxu0 %v2363_v29  ;;  %764 = vmatpush1.bf16.msra.mxu1 %v2377_v33 }
 0x18e   : > { %724 = vmatprep.subr.bf16.mxu0 %v2372_v31  ;;  %765 = vmatprep.subr.bf16.mxu1 %v2385_v35 }
 0x191   : > { %725 = vmatpush1.bf16.msra.mxu0 %v2382_v34  ;;  %766 = vmatpush1.bf16.msra.mxu1 %v2390_v36 }
 0x192   : > { %834 = vmatprep.subr.bf16.mxu0 %v2254_v1  ;;  %875 = vmatprep.subr.bf16.mxu1 %v2265_v4 }
 0x247   : > { %v620_v54 = vpop.f32.mrb[4].mxu0  ;;  %v661_v55 = vpop.f32.mrb[4].mxu1 }
 0x248   : > { %v668_v56 = vadd.f32 %v620_v54, %v581_v51  ;;  %v622_v58 = vpop.f32.mrb[5].mxu0  ;;  %v663_v59 = vpop.f32.mrb[5].mxu1  ;;  %v670_v38 = vadd.f32 %v661_v55, %v583_v57 }
 0x249   : > { %v669_v60 = vadd.f32 %v622_v58, %v582_v53  ;;  %v624_v61 = vpop.f32.mrb[6].mxu0  ;;  %v665_v62 = vpop.f32.mrb[6].mxu1  ;;  %v671_v41 = vadd.f32 %v663_v59, %v584_v39 }
 0x24a   : > { %v672_v63 = vmul.f32 0.5, %v668_v56  ;;  %v625_v21 = vpop.f32.mrb[7].mxu0  ;;  %v666_v32 = vpop.f32.mrb[7].mxu1  ;;  %v1624_v61 = vld [vmem:[%s2235_s9 + $0x20] sm:$0xff] }
 0x24b   : > { %v676_v37 = vmul.f32 0.5, %v669_v60  ;;  %v681_v42 = vmul.f32 0.5, %v671_v41  ;;  %v697_v55 = vpop.permute.xlu0 %696  ;;  %v705_v62 = vunpack.c.l.bf16 %v1624_v61  ;;  %v706_v21 = vunpack.c.h.bf16 %v1624_v61 }
 0x24c   : > { %1788 = vtanh.f32 %v672_v63  ;;  %vm698_vm8 = vcmp.eq.s32.totalorder %v697_v55, 1  ;;  %v1625_v63 = vld [vmem:[%s2235_s9 + $0x28] sm:$0xff] }
 0x24d   : > { %1790 = vtanh.f32 %v676_v37  ;;  %v707_v39 = vunpack.c.l.bf16 %v1625_v63 }
 0x24e   : > { %1792 = vtanh.f32 %v670_v38 }
 0x24f   : > { %1794 = vtanh.f32 %v681_v42 }
 0x256   : > { %v1789_v43 = vpop.eup %1788 }
 0x257   : > { %v1791_v44 = vpop.eup %1790  ;;  %v674_v45 = vmul.f32 0.5, %v1789_v43 }
 0x258   : > { %v678_v46 = vmul.f32 0.5, %v1791_v44  ;;  %v1793_v48 = vpop.eup %1792 }
 0x259   : > { %v675_v47 = vadd.f32 0.5, %v674_v45  ;;  %v1795_v52 = vpop.eup %1794 }
 0x25a   : > { %v679_v49 = vadd.f32 0.5, %v678_v46  ;;  %v683_v54 = vmul.f32 0.5, %v1795_v52 }
 0x25b   : > { %v686_v50 = vmul.f32 %v1793_v48, %v675_v47 }
 0x25c   : > { %v685_v51 = vmul.f32 %v679_v49, %v2437_v40  ;;  %v684_v56 = vadd.f32 0.5, %v683_v54  ;;  %v942_v40 = vsel %vm941_vm10, 1, %v2043_v0 }
 0x25d   : > { %944 = vperm.xlu1 %1729, %v942_v40  }
 0x25e   : > { %v2485_v53 = vadd.f32 %v686_v50, %v685_v51  ;;  %v708_v51 = vunpack.c.h.bf16 %v1625_v63 }
 0x260   : > { %1796 = vtanh.f32 %v2485_v53 }
 0x26a   : > { %v1797_v57 = vpop.eup %1796 }
 0x26b   : > { %v689_v58 = vmul.f32 %v1797_v57, %v684_v56 }
 0x26d   : > { %v699_v59 = vsel %vm698_vm8, %v689_v58, 0.0  ;;  %v709_v60 = vpack.c.bf16 %v689_v58, %v689_v58 }
 0x26e   : > { %1623 = vst [vmem:[%s2441_s6 + $0x8] sm:$0xff] %v699_v59 }
 0x26f   : > { %743 = vmatmul.mubr.bf16.vlgmr.msra.gmra.mrb[8].mxu0 %v709_v60  ;;  %784 = vmatmul.mubr.bf16.vlgmr.msra.gmra.mrb[8].mxu1 %v709_v60 }
 0x270   : > { %835 = vmatpush1.bf16.msra.mxu0 %v2257_v2  ;;  %876 = vmatpush1.bf16.msra.mxu1 %v2271_v6 }
 0x271   : > { %836 = vmatprep.subr.bf16.mxu0 %v2261_v3  ;;  %877 = vmatprep.subr.bf16.mxu1 %v2279_v8 }
 0x272   : > { %866 = vmatprep.mubr.bf16.mxu0 %v2043_v0  ;;  %907 = vmatprep.mubr.bf16.mxu1 %v2043_v0 }
 0x274   : > { %837 = vmatpush1.bf16.msra.mxu0 %v2268_v5  ;;  %878 = vmatpush1.bf16.msra.mxu1 %v2283_v9 }
 0x275   : > { %838 = vmatprep.subr.bf16.mxu0 %v2275_v7  ;;  %879 = vmatprep.subr.bf16.mxu1 %v2295_v12 }
 0x278   : > { %839 = vmatpush1.bf16.msra.mxu0 %v2288_v10  ;;  %880 = vmatpush1.bf16.msra.mxu1 %v2300_v13 }
 0x279   : > { %840 = vmatprep.subr.bf16.mxu0 %v2292_v11  ;;  %881 = vmatprep.subr.bf16.mxu1 %v2308_v15 }
 0x27c   : > { %841 = vmatpush1.bf16.msra.mxu0 %v2305_v14  ;;  %882 = vmatpush1.bf16.msra.mxu1 %v2319_v18 }
 0x27d   : > { %842 = vmatprep.subr.bf16.mxu0 %v2312_v16  ;;  %883 = vmatprep.subr.bf16.mxu1 %v2324_v19 }
 0x280   : > { %843 = vmatpush1.bf16.msra.mxu0 %v2316_v17  ;;  %884 = vmatpush1.bf16.msra.mxu1 %v2332_v22 }
 0x281   : > { %844 = vmatprep.subr.bf16.mxu0 %v2328_v20  ;;  %885 = vmatprep.subr.bf16.mxu1 %v2340_v24 }
 0x284   : > { %845 = vmatpush1.bf16.msra.mxu0 %v2337_v23  ;;  %886 = vmatpush1.bf16.msra.mxu1 %v2357_v28 }
 0x285   : > { %846 = vmatprep.subr.bf16.mxu0 %v2344_v25  ;;  %887 = vmatprep.subr.bf16.mxu1 %v2366_v30 }
 0x288   : > { %847 = vmatpush1.bf16.msra.mxu0 %v2363_v29  ;;  %888 = vmatpush1.bf16.msra.mxu1 %v2377_v33 }
 0x289   : > { %848 = vmatprep.subr.bf16.mxu0 %v2372_v31  ;;  %889 = vmatprep.subr.bf16.mxu1 %v2385_v35 }
 0x28c   : > { %849 = vmatpush1.bf16.msra.mxu0 %v2382_v34  ;;  %890 = vmatpush1.bf16.msra.mxu1 %v2390_v36 }
 0x28d   : > { %958 = vmatprep.subr.bf16.mxu0 %v2254_v1  ;;  %999 = vmatprep.subr.bf16.mxu1 %v2265_v4 }
 0x342   : > { %v744_v32 = vpop.f32.mrb[8].mxu0  ;;  %v785_v37 = vpop.f32.mrb[8].mxu1 }
 0x343   : > { %v792_v38 = vadd.f32 %v744_v32, %v705_v62  ;;  %v746_v41 = vpop.f32.mrb[9].mxu0  ;;  %v787_v42 = vpop.f32.mrb[9].mxu1  ;;  %v794_v50 = vadd.f32 %v785_v37, %v707_v39 }
 0x344   : > { %v793_v43 = vadd.f32 %v746_v41, %v706_v21  ;;  %v748_v44 = vpop.f32.mrb[10].mxu0  ;;  %v789_v45 = vpop.f32.mrb[10].mxu1  ;;  %v795_v52 = vadd.f32 %v787_v42, %v708_v51 }
 0x345   : > { %v796_v46 = vmul.f32 0.5, %v792_v38  ;;  %v749_v47 = vpop.f32.mrb[11].mxu0  ;;  %v790_v48 = vpop.f32.mrb[11].mxu1  ;;  %v1628_v44 = vld [vmem:[%s2235_s9 + $0x30] sm:$0xff] }
 0x346   : > { %v800_v49 = vmul.f32 0.5, %v793_v43  ;;  %v805_v54 = vmul.f32 0.5, %v795_v52  ;;  %v821_v37 = vpop.permute.xlu1 %820  ;;  %v829_v45 = vunpack.c.l.bf16 %v1628_v44  ;;  %v830_v47 = vunpack.c.h.bf16 %v1628_v44 }
 0x347   : > { %1798 = vtanh.f32 %v796_v46  ;;  %vm822_vm11 = vcmp.eq.s32.totalorder %v821_v37, 1  ;;  %v1629_v46 = vld [vmem:[%s2235_s9 + $0x38] sm:$0xff] }
 0x348   : > { %1800 = vtanh.f32 %v800_v49  ;;  %v831_v51 = vunpack.c.l.bf16 %v1629_v46 }
 0x349   : > { %1802 = vtanh.f32 %v794_v50 }
 0x34a   : > { %1804 = vtanh.f32 %v805_v54 }
 0x351   : > { %v1799_v55 = vpop.eup %1798 }
 0x352   : > { %v1801_v56 = vpop.eup %1800  ;;  %v798_v57 = vmul.f32 0.5, %v1799_v55 }
 0x353   : > { %v802_v58 = vmul.f32 0.5, %v1801_v56  ;;  %v1803_v60 = vpop.eup %1802 }
 0x354   : > { %v799_v59 = vadd.f32 0.5, %v798_v57  ;;  %v1805_v63 = vpop.eup %1804 }
 0x355   : > { %v803_v40 = vadd.f32 0.5, %v802_v58  ;;  %v807_v32 = vmul.f32 0.5, %v1805_v63 }
 0x356   : > { %v810_v61 = vmul.f32 %v1803_v60, %v799_v59 }
 0x357   : > { %v809_v62 = vmul.f32 %v803_v40, %v2485_v53  ;;  %v808_v38 = vadd.f32 0.5, %v807_v32  ;;  %v1066_v53 = vsel %vm1065_vm13, 1, %v2043_v0 }
 0x358   : > { %1068 = vperm.xlu0 %1728, %v1066_v53  }
 0x359   : > { %v2530_v21 = vadd.f32 %v810_v61, %v809_v62  ;;  %v832_v62 = vunpack.c.h.bf16 %v1629_v46 }
 0x35b   : > { %1806 = vtanh.f32 %v2530_v21 }
 0x365   : > { %v1807_v39 = vpop.eup %1806 }
 0x366   : > { %v813_v41 = vmul.f32 %v1807_v39, %v808_v38 }
 0x368   : > { %v823_v42 = vsel %vm822_vm11, %v813_v41, 0.0  ;;  %v833_v43 = vpack.c.bf16 %v813_v41, %v813_v41 }
 0x369   : > { %1627 = vst [vmem:[%s2441_s6 + $0x10] sm:$0xff] %v823_v42 }
 0x36a   : > { %867 = vmatmul.mubr.bf16.vlgmr.msra.gmra.mrb[12].mxu0 %v833_v43  ;;  %908 = vmatmul.mubr.bf16.vlgmr.msra.gmra.mrb[12].mxu1 %v833_v43 }
 0x36b   : > { %959 = vmatpush1.bf16.msra.mxu0 %v2257_v2  ;;  %1000 = vmatpush1.bf16.msra.mxu1 %v2271_v6 }
 0x36c   : > { %960 = vmatprep.subr.bf16.mxu0 %v2261_v3  ;;  %1001 = vmatprep.subr.bf16.mxu1 %v2279_v8 }
 0x36d   : > { %990 = vmatprep.mubr.bf16.mxu0 %v2043_v0  ;;  %1031 = vmatprep.mubr.bf16.mxu1 %v2043_v0 }
 0x36f   : > { %961 = vmatpush1.bf16.msra.mxu0 %v2268_v5  ;;  %1002 = vmatpush1.bf16.msra.mxu1 %v2283_v9 }
 0x370   : > { %962 = vmatprep.subr.bf16.mxu0 %v2275_v7  ;;  %1003 = vmatprep.subr.bf16.mxu1 %v2295_v12 }
 0x373   : > { %963 = vmatpush1.bf16.msra.mxu0 %v2288_v10  ;;  %1004 = vmatpush1.bf16.msra.mxu1 %v2300_v13 }
 0x374   : > { %964 = vmatprep.subr.bf16.mxu0 %v2292_v11  ;;  %1005 = vmatprep.subr.bf16.mxu1 %v2308_v15 }
 0x377   : > { %965 = vmatpush1.bf16.msra.mxu0 %v2305_v14  ;;  %1006 = vmatpush1.bf16.msra.mxu1 %v2319_v18 }
 0x378   : > { %966 = vmatprep.subr.bf16.mxu0 %v2312_v16  ;;  %1007 = vmatprep.subr.bf16.mxu1 %v2324_v19 }
 0x37b   : > { %967 = vmatpush1.bf16.msra.mxu0 %v2316_v17  ;;  %1008 = vmatpush1.bf16.msra.mxu1 %v2332_v22 }
 0x37c   : > { %968 = vmatprep.subr.bf16.mxu0 %v2328_v20  ;;  %1009 = vmatprep.subr.bf16.mxu1 %v2340_v24 }
 0x37f   : > { %969 = vmatpush1.bf16.msra.mxu0 %v2337_v23  ;;  %1010 = vmatpush1.bf16.msra.mxu1 %v2357_v28 }
 0x380   : > { %970 = vmatprep.subr.bf16.mxu0 %v2344_v25  ;;  %1011 = vmatprep.subr.bf16.mxu1 %v2366_v30 }
 0x383   : > { %971 = vmatpush1.bf16.msra.mxu0 %v2363_v29  ;;  %1012 = vmatpush1.bf16.msra.mxu1 %v2377_v33 }
 0x384   : > { %972 = vmatprep.subr.bf16.mxu0 %v2372_v31  ;;  %1013 = vmatprep.subr.bf16.mxu1 %v2385_v35 }
 0x387   : > { %973 = vmatpush1.bf16.msra.mxu0 %v2382_v34  ;;  %1014 = vmatpush1.bf16.msra.mxu1 %v2390_v36 }
 0x388   : > { %1082 = vmatprep.subr.bf16.mxu0 %v2254_v1  ;;  %1123 = vmatprep.subr.bf16.mxu1 %v2265_v4 }
 0x43d   : > { %v868_v48 = vpop.f32.mrb[12].mxu0  ;;  %v909_v49 = vpop.f32.mrb[12].mxu1 }
 0x43e   : > { %v916_v50 = vadd.f32 %v868_v48, %v829_v45  ;;  %v870_v52 = vpop.f32.mrb[13].mxu0  ;;  %v911_v54 = vpop.f32.mrb[13].mxu1  ;;  %v918_v61 = vadd.f32 %v909_v49, %v831_v51 }
 0x43f   : > { %v917_v55 = vadd.f32 %v870_v52, %v830_v47  ;;  %v872_v56 = vpop.f32.mrb[14].mxu0  ;;  %v913_v57 = vpop.f32.mrb[14].mxu1  ;;  %v919_v63 = vadd.f32 %v911_v54, %v832_v62 }
 0x440   : > { %v920_v58 = vmul.f32 0.5, %v916_v50  ;;  %v873_v59 = vpop.f32.mrb[15].mxu0  ;;  %v914_v60 = vpop.f32.mrb[15].mxu1 }
 0x441   : > { %v924_v40 = vmul.f32 0.5, %v917_v55  ;;  %v929_v32 = vmul.f32 0.5, %v919_v63  ;;  %v945_v49 = vpop.permute.xlu1 %944 }
 0x442   : > { %1808 = vtanh.f32 %v920_v58  ;;  %vm946_vm14 = vcmp.eq.s32.totalorder %v945_v49, 1 }
 0x443   : > { %1810 = vtanh.f32 %v924_v40 }
 0x444   : > { %1812 = vtanh.f32 %v918_v61 }
 0x445   : > { %1814 = vtanh.f32 %v929_v32 }
 0x44c   : > { %v1809_v37 = vpop.eup %1808 }
 0x44d   : > { %v1811_v38 = vpop.eup %1810  ;;  %v922_v39 = vmul.f32 0.5, %v1809_v37 }
 0x44e   : > { %v926_v41 = vmul.f32 0.5, %v1811_v38  ;;  %v1813_v43 = vpop.eup %1812 }
 0x44f   : > { %v923_v42 = vadd.f32 0.5, %v922_v39  ;;  %v1815_v46 = vpop.eup %1814 }
 0x450   : > { %v927_v53 = vadd.f32 0.5, %v926_v41  ;;  %v931_v48 = vmul.f32 0.5, %v1815_v46 }
 0x451   : > { %v934_v44 = vmul.f32 %v1813_v43, %v923_v42 }
 0x452   : > { %v933_v45 = vmul.f32 %v927_v53, %v2530_v21  ;;  %v932_v50 = vadd.f32 0.5, %v931_v48 }
 0x454   : > { %v2575_v47 = vadd.f32 %v934_v44, %v933_v45  ;;  %v1069_v45 = vpop.permute.xlu0 %1068 }
 0x455   : > { %vm1070_vm2 = vcmp.eq.s32.totalorder %v1069_v45, 1  ;;  %v1874_v45 = vld [vmem:[%s2243_s11 + $0x68] ss:$16 sps:$4 sm:$0xff]  }
 0x456   : > { %1816 = vtanh.f32 %v2575_v47 }
 0x460   : > { %v1817_v51 = vpop.eup %1816 }
 0x461   : > { %v937_v52 = vmul.f32 %v1817_v51, %v932_v50 }
 0x463   : > { %v947_v54 = vsel %vm946_vm14, %v937_v52, 0.0  ;;  %v957_v55 = vpack.c.bf16 %v937_v52, %v937_v52  ;;  %v2629_v52 = vld [vmem:[%s2243_s11 + $0x8] ss:$16 sps:$4 sm:$0xff]  }
 0x464   : > { %1631 = vst [vmem:[%s2441_s6 + $0x18] sm:$0xff] %v947_v54  ;;  %v2633_v54 = vld [vmem:[%s2243_s11 + $0x24] ss:$16 sps:$4 sm:$0xff]  }
 0x465   : > { %991 = vmatmul.mubr.bf16.vlgmr.msra.gmra.mrb[16].mxu0 %v957_v55  ;;  %1032 = vmatmul.mubr.bf16.vlgmr.msra.gmra.mrb[16].mxu1 %v957_v55  ;;  %v2637_v55 = vld [vmem:[%s2243_s11 + $0x2c] ss:$16 sps:$4 sm:$0xff]  }
 0x466   : > { %1083 = vmatpush1.bf16.msra.mxu0 %v2257_v2  ;;  %1124 = vmatpush1.bf16.msra.mxu1 %v2271_v6  ;;  %v1190_v2 = vsel %vm1189_vm1, 1, %v2043_v0  ;;  %v1633_v6 = vld [vmem:[%s2235_s9 + $0x48] sm:$0xff] }
 0x467   : > { %1084 = vmatprep.subr.bf16.mxu0 %v2261_v3  ;;  %1125 = vmatprep.subr.bf16.mxu1 %v2279_v8  ;;  %v1632_v3 = vld [vmem:[%s2235_s9 + $0x40] sm:$0xff]  ;;  %v956_v59 = vunpack.c.h.bf16 %v1633_v6 }
 0x468   : > { %1114 = vmatprep.mubr.bf16.mxu0 %v2043_v0  ;;  %1155 = vmatprep.mubr.bf16.mxu1 %v2043_v0 }
 0x469   : > { %1192 = vperm.xlu1 %1729, %v1190_v2   ;;  %v2643_v2 = vld [vmem:[%s2243_s11 + $0x20] ss:$16 sps:$4 sm:$0xff]  }
 0x46a   : > { %1085 = vmatpush1.bf16.msra.mxu0 %v2268_v5  ;;  %1126 = vmatpush1.bf16.msra.mxu1 %v2283_v9  ;;  %v953_v5 = vunpack.c.l.bf16 %v1632_v3 }
 0x46b   : > { %1086 = vmatprep.subr.bf16.mxu0 %v2275_v7  ;;  %1127 = vmatprep.subr.bf16.mxu1 %v2295_v12  ;;  %v954_v7 = vunpack.c.h.bf16 %v1632_v3  ;;  %v2647_v3 = vld [vmem:[%s2243_s11 + $0x28] ss:$16 sps:$4 sm:$0xff]  }
 0x46e   : > { %1087 = vmatpush1.bf16.msra.mxu0 %v2288_v10  ;;  %1128 = vmatpush1.bf16.msra.mxu1 %v2300_v13 }
 0x46f   : > { %1088 = vmatprep.subr.bf16.mxu0 %v2292_v11  ;;  %1129 = vmatprep.subr.bf16.mxu1 %v2308_v15  ;;  %v955_v11 = vunpack.c.l.bf16 %v1633_v6  ;;  %v2655_v6 = vld [vmem:[%s2243_s11 + $0x4c] ss:$16 sps:$4 sm:$0xff]  }
 0x472   : > { %1089 = vmatpush1.bf16.msra.mxu0 %v2305_v14  ;;  %1130 = vmatpush1.bf16.msra.mxu1 %v2319_v18 }
 0x473   : > { %1090 = vmatprep.subr.bf16.mxu0 %v2312_v16  ;;  %1131 = vmatprep.subr.bf16.mxu1 %v2324_v19 }
 0x476   : > { %1091 = vmatpush1.bf16.msra.mxu0 %v2316_v17  ;;  %1132 = vmatpush1.bf16.msra.mxu1 %v2332_v22 }
 0x477   : > { %1092 = vmatprep.subr.bf16.mxu0 %v2328_v20  ;;  %1133 = vmatprep.subr.bf16.mxu1 %v2340_v24 }
 0x47a   : > { %1093 = vmatpush1.bf16.msra.mxu0 %v2337_v23  ;;  %1134 = vmatpush1.bf16.msra.mxu1 %v2357_v28 }
 0x47b   : > { %1094 = vmatprep.subr.bf16.mxu0 %v2344_v25  ;;  %1135 = vmatprep.subr.bf16.mxu1 %v2366_v30 }
 0x47e   : > { %1095 = vmatpush1.bf16.msra.mxu0 %v2363_v29  ;;  %1136 = vmatpush1.bf16.msra.mxu1 %v2377_v33 }
 0x47f   : > { %1096 = vmatprep.subr.bf16.mxu0 %v2372_v31  ;;  %1137 = vmatprep.subr.bf16.mxu1 %v2385_v35 }
 0x482   : > { %1097 = vmatpush1.bf16.msra.mxu0 %v2382_v34  ;;  %1138 = vmatpush1.bf16.msra.mxu1 %v2390_v36 }
 0x483   : > { %1206 = vmatprep.subr.bf16.mxu0 %v2254_v1  ;;  %1247 = vmatprep.subr.bf16.mxu1 %v2265_v4 }
 0x538   : > { %v992_v8 = vpop.f32.mrb[16].mxu0  ;;  %v1033_v9 = vpop.f32.mrb[16].mxu1 }
 0x539   : > { %v1040_v10 = vadd.f32 %v992_v8, %v953_v5  ;;  %v994_v12 = vpop.f32.mrb[17].mxu0  ;;  %v1035_v1 = vpop.f32.mrb[17].mxu1  ;;  %v1042_v58 = vadd.f32 %v1033_v9, %v955_v11  ;;  %v2651_v5 = vld [vmem:[%s2243_s11 + $0x44] ss:$16 sps:$4 sm:$0xff]   ;;  %v2663_v8 = vld [vmem:[%s2243_s11 + $0x48] ss:$16 sps:$4 sm:$0xff]  }
 0x53a   : > { %v1041_v13 = vadd.f32 %v994_v12, %v954_v7  ;;  %v996_v4 = vpop.f32.mrb[18].mxu0  ;;  %v1037_v14 = vpop.f32.mrb[18].mxu1  ;;  %v1043_v60 = vadd.f32 %v1035_v1, %v956_v59  ;;  %v2659_v7 = vld [vmem:[%s2243_s11 + $0x40] ss:$16 sps:$4 sm:$0xff]   ;;  %v2667_v9 = vld [vmem:[%s2243_s11 + $0x64] ss:$16 sps:$4 sm:$0xff]  }
 0x53b   : > { %v1044_v16 = vmul.f32 0.5, %v1040_v10  ;;  %v997_v21 = vpop.f32.mrb[19].mxu0  ;;  %v1038_v56 = vpop.f32.mrb[19].mxu1  ;;  %v2672_v10 = vld [vmem:[%s2243_s11 + $0x60] ss:$16 sps:$4 sm:$0xff]  }
 0x53c   : > { %v1048_v57 = vmul.f32 0.5, %v1041_v13  ;;  %v1053_v40 = vmul.f32 0.5, %v1043_v60  ;;  %v2677_v11 = vld [vmem:[%s2243_s11 + $0x84] ss:$16 sps:$4 sm:$0xff]  }
 0x53d   : > { %1818 = vtanh.f32 %v1044_v16 }
 0x53e   : > { %1820 = vtanh.f32 %v1048_v57 }
 0x53f   : > { %1822 = vtanh.f32 %v1042_v58 }
 0x540   : > { %1824 = vtanh.f32 %v1053_v40 }
 0x547   : > { %v1819_v61 = vpop.eup %1818 }
 0x548   : > { %v1821_v62 = vpop.eup %1820  ;;  %v1046_v63 = vmul.f32 0.5, %v1819_v61 }
 0x549   : > { %v1050_v32 = vmul.f32 0.5, %v1821_v62  ;;  %v1823_v38 = vpop.eup %1822 }
 0x54a   : > { %v1047_v37 = vadd.f32 0.5, %v1046_v63  ;;  %v1825_v53 = vpop.eup %1824 }
 0x54b   : > { %v1051_v39 = vadd.f32 0.5, %v1050_v32  ;;  %v1055_v44 = vmul.f32 0.5, %v1825_v53 }
 0x54c   : > { %v1058_v41 = vmul.f32 %v1823_v38, %v1047_v37  ;;  %v1193_v38 = vpop.permute.xlu1 %1192 }
 0x54d   : > { %v1057_v42 = vmul.f32 %v1051_v39, %v2575_v47  ;;  %v1056_v46 = vadd.f32 0.5, %v1055_v44  ;;  %v2625_v47 = vld [vmem:[%s2243_s11] ss:$16 sps:$4 sm:$0xff]   ;;  %vm1194_vm5 = vcmp.eq.s32.totalorder %v1193_v38, 1 }
 0x54f   : > { %v2620_v43 = vadd.f32 %v1058_v41, %v1057_v42 }
 0x551   : > { %1826 = vtanh.f32 %v2620_v43 }
 0x55b   : > { %v1827_v48 = vpop.eup %1826 }
 0x55c   : > { %v1061_v49 = vmul.f32 %v1827_v48, %v1056_v46  ;;  %v1875_v46 = vld [vmem:[%s2243_s11 + $0x8c] ss:$16 sps:$4 sm:$0xff]   ;;  %v1876_v48 = vld [vmem:[%s2243_s11 + $0x80] ss:$16 sps:$4 sm:$0xff]  }
 0x55e   : > { %v1071_v50 = vsel %vm1070_vm2, %v1061_v49, 0.0  ;;  %v1081_v51 = vpack.c.bf16 %v1061_v49, %v1061_v49  ;;  %v1877_v49 = vld [vmem:[%s2243_s11 + $0x88] ss:$16 sps:$4 sm:$0xff]  }
 0x55f   : > { %1635 = vst [vmem:[%s2441_s6 + $0x20] sm:$0xff] %v1071_v50  ;;  %v1878_v50 = vld [vmem:[%s2243_s11 + $0xa4] ss:$16 sps:$4 sm:$0xff]  }
 0x560   : > { %1115 = vmatmul.mubr.bf16.vlgmr.msra.gmra.mrb[20].mxu0 %v1081_v51  ;;  %1156 = vmatmul.mubr.bf16.vlgmr.msra.gmra.mrb[20].mxu1 %v1081_v51  ;;  %v1879_v51 = vld [vmem:[%s2243_s11 + $0xac] ss:$16 sps:$4 sm:$0xff]  }
 0x561   : > { %1207 = vmatpush1.bf16.msra.mxu0 %v2625_v47  ;;  %1248 = vmatpush1.bf16.msra.mxu1 %v2629_v52 }
 0x562   : > { %1208 = vmatprep.subr.bf16.mxu0 %v2633_v54  ;;  %1249 = vmatprep.subr.bf16.mxu1 %v2637_v55 }
 0x563   : > { %1238 = vmatprep.mubr.bf16.mxu0 %v2043_v0  ;;  %1279 = vmatprep.mubr.bf16.mxu1 %v2043_v0 }
 0x565   : > { %1209 = vmatpush1.bf16.msra.mxu0 %v2643_v2  ;;  %1250 = vmatpush1.bf16.msra.mxu1 %v2647_v3 }
 0x566   : > { %1210 = vmatprep.subr.bf16.mxu0 %v2651_v5  ;;  %1251 = vmatprep.subr.bf16.mxu1 %v2655_v6 }
 0x569   : > { %1211 = vmatpush1.bf16.msra.mxu0 %v2659_v7  ;;  %1252 = vmatpush1.bf16.msra.mxu1 %v2663_v8 }
 0x56a   : > { %1212 = vmatprep.subr.bf16.mxu0 %v2667_v9  ;;  %1253 = vmatprep.subr.bf16.mxu1 %v2308_v15  ;;  %v1871_v15 = vld [vmem:[%s2243_s11 + $0x4] ss:$16 sps:$4 sm:$0xff]  }
 0x56d   : > { %1213 = vmatpush1.bf16.msra.mxu0 %v2672_v10  ;;  %1254 = vmatpush1.bf16.msra.mxu1 %v2319_v18  ;;  %v1314_v18 = vsel %vm1313_vm4, 1, %v2043_v0 }
 0x56e   : > { %1214 = vmatprep.subr.bf16.mxu0 %v2677_v11  ;;  %1255 = vmatprep.subr.bf16.mxu1 %v2324_v19  ;;  %v1636_v19 = vld [vmem:[%s2235_s9 + $0x50] sm:$0xff] }
 0x56f   : > { %1316 = vperm.xlu0 %1728, %v1314_v18  }
 0x571   : > { %1215 = vmatpush1.bf16.msra.mxu0 %v2316_v17  ;;  %1256 = vmatpush1.bf16.msra.mxu1 %v2332_v22  ;;  %v1872_v17 = vld [vmem:[%s2243_s11 + $0xc] ss:$16 sps:$4 sm:$0xff]  }
 0x572   : > { %1216 = vmatprep.subr.bf16.mxu0 %v2328_v20  ;;  %1257 = vmatprep.subr.bf16.mxu1 %v2340_v24  ;;  %v1077_v20 = vunpack.c.l.bf16 %v1636_v19  ;;  %v1637_v22 = vld [vmem:[%s2235_s9 + $0x58] sm:$0xff] }
 0x573   : > { %v1080_v4 = vunpack.c.h.bf16 %v1637_v22 }
 0x575   : > { %1217 = vmatpush1.bf16.msra.mxu0 %v2337_v23  ;;  %1258 = vmatpush1.bf16.msra.mxu1 %v2357_v28  ;;  %v1078_v23 = vunpack.c.h.bf16 %v1636_v19 }
 0x576   : > { %1218 = vmatprep.subr.bf16.mxu0 %v2344_v25  ;;  %1259 = vmatprep.subr.bf16.mxu1 %v2366_v30 }
 0x579   : > { %1219 = vmatpush1.bf16.msra.mxu0 %v2363_v29  ;;  %1260 = vmatpush1.bf16.msra.mxu1 %v2377_v33  ;;  %v1079_v29 = vunpack.c.l.bf16 %v1637_v22 }
 0x57a   : > { %1220 = vmatprep.subr.bf16.mxu0 %v2372_v31  ;;  %1261 = vmatprep.subr.bf16.mxu1 %v2385_v35 }
 0x57d   : > { %1221 = vmatpush1.bf16.msra.mxu0 %v2382_v34  ;;  %1262 = vmatpush1.bf16.msra.mxu1 %v2390_v36 }
 0x57e   : > { %1330 = vmatprep.subr.bf16.mxu0 %v1871_v15  ;;  %1371 = vmatprep.subr.bf16.mxu1 %v1872_v17  ;;  %v1641_v17 = vld [vmem:[%s2235_s9 + $0x68] sm:$0xff] }
 0x633   : > { %v1116_v24 = vpop.f32.mrb[20].mxu0  ;;  %v1157_v25 = vpop.f32.mrb[20].mxu1 }
 0x634   : > { %v1164_v28 = vadd.f32 %v1116_v24, %v1077_v20  ;;  %v1118_v30 = vpop.f32.mrb[21].mxu0  ;;  %v1159_v31 = vpop.f32.mrb[21].mxu1  ;;  %v1166_v13 = vadd.f32 %v1157_v25, %v1079_v29 }
 0x635   : > { %v1165_v33 = vadd.f32 %v1118_v30, %v1078_v23  ;;  %v1120_v34 = vpop.f32.mrb[22].mxu0  ;;  %v1161_v35 = vpop.f32.mrb[22].mxu1  ;;  %v1167_v14 = vadd.f32 %v1159_v31, %v1080_v4  ;;  %v1203_v23 = vunpack.c.l.bf16 %v1641_v17 }
 0x636   : > { %v1168_v27 = vmul.f32 0.5, %v1164_v28  ;;  %v1121_v36 = vpop.f32.mrb[23].mxu0  ;;  %v1162_v12 = vpop.f32.mrb[23].mxu1  ;;  %v1204_v35 = vunpack.c.h.bf16 %v1641_v17 }
 0x637   : > { %v1172_v1 = vmul.f32 0.5, %v1165_v33  ;;  %v1177_v16 = vmul.f32 0.5, %v1167_v14 }
 0x638   : > { %1828 = vtanh.f32 %v1168_v27 }
 0x639   : > { %1830 = vtanh.f32 %v1172_v1 }
 0x63a   : > { %1832 = vtanh.f32 %v1166_v13 }
 0x63b   : > { %1834 = vtanh.f32 %v1177_v16 }
 0x642   : > { %v1829_v21 = vpop.eup %1828 }
 0x643   : > { %v1831_v56 = vpop.eup %1830  ;;  %v1170_v57 = vmul.f32 0.5, %v1829_v21 }
 0x644   : > { %v1174_v58 = vmul.f32 0.5, %v1831_v56  ;;  %v1833_v60 = vpop.eup %1832 }
 0x645   : > { %v1171_v59 = vadd.f32 0.5, %v1170_v57  ;;  %v1835_v32 = vpop.eup %1834 }
 0x646   : > { %v1175_v40 = vadd.f32 0.5, %v1174_v58  ;;  %v1179_v37 = vmul.f32 0.5, %v1835_v32 }
 0x647   : > { %v1182_v61 = vmul.f32 %v1833_v60, %v1171_v59 }
 0x648   : > { %v1181_v62 = vmul.f32 %v1175_v40, %v2620_v43  ;;  %v1180_v39 = vadd.f32 0.5, %v1179_v37  ;;  %v1873_v43 = vld [vmem:[%s2243_s11 + $0x6c] ss:$16 sps:$4 sm:$0xff]   ;;  %v1317_v40 = vpop.permute.xlu0 %1316 }
 0x64a   : > { %v2704_v63 = vadd.f32 %v1182_v61, %v1181_v62 }
 0x64c   : > { %1836 = vtanh.f32 %v2704_v63 }
 0x656   : > { %v1837_v41 = vpop.eup %1836 }
 0x657   : > { %v1185_v42 = vmul.f32 %v1837_v41, %v1180_v39  ;;  %v1644_v39 = vld [vmem:[%s2235_s9 + $0x70] sm:$0xff] }
 0x658   : > { %v1325_v41 = vunpack.c.l.bf16 %v1644_v39 }
 0x659   : > { %v1195_v53 = vsel %vm1194_vm5, %v1185_v42, 0.0  ;;  %v1205_v44 = vpack.c.bf16 %v1185_v42, %v1185_v42  ;;  %v1645_v42 = vld [vmem:[%s2235_s9 + $0x78] sm:$0xff] }
 0x65a   : > { %1639 = vst [vmem:[%s2441_s6 + $0x28] sm:$0xff] %v1195_v53  ;;  %v1326_v53 = vunpack.c.h.bf16 %v1644_v39 }
 0x65b   : > { %1239 = vmatmul.mubr.bf16.vlgmr.msra.gmra.mrb[24].mxu0 %v1205_v44  ;;  %1280 = vmatmul.mubr.bf16.vlgmr.msra.gmra.mrb[24].mxu1 %v1205_v44 }
 0x65c   : > { %1331 = vmatpush1.bf16.msra.mxu0 %v2625_v47  ;;  %1372 = vmatpush1.bf16.msra.mxu1 %v2629_v52  ;;  %v1880_v47 = vld [vmem:[%s2243_s11 + $0xa0] ss:$16 sps:$4 sm:$0xff]   ;;  %v1881_v52 = vld [vmem:[%s2243_s11 + $0xa8] ss:$16 sps:$4 sm:$0xff]  }
 0x65d   : > { %1332 = vmatprep.subr.bf16.mxu0 %v2633_v54  ;;  %1373 = vmatprep.subr.bf16.mxu1 %v2637_v55  ;;  %v1882_v54 = vld [vmem:[%s2243_s11 + $0xc4] ss:$16 sps:$4 sm:$0xff]   ;;  %v1883_v55 = vld [vmem:[%s2243_s11 + $0xcc] ss:$16 sps:$4 sm:$0xff]  }
 0x65e   : > { %1362 = vmatprep.mubr.bf16.mxu0 %v2043_v0  ;;  %1403 = vmatprep.mubr.bf16.mxu1 %v2043_v0 }
 0x660   : > { %1333 = vmatpush1.bf16.msra.mxu0 %v2643_v2  ;;  %1374 = vmatpush1.bf16.msra.mxu1 %v2647_v3  ;;  %v1884_v2 = vld [vmem:[%s2243_s11 + $0xc0] ss:$16 sps:$4 sm:$0xff]   ;;  %v1885_v3 = vld [vmem:[%s2243_s11 + $0xc8] ss:$16 sps:$4 sm:$0xff]  }
 0x661   : > { %1334 = vmatprep.subr.bf16.mxu0 %v2651_v5  ;;  %1375 = vmatprep.subr.bf16.mxu1 %v2655_v6  ;;  %v1886_v5 = vld [vmem:[%s2243_s11 + $0xe4] ss:$16 sps:$4 sm:$0xff]   ;;  %v1887_v6 = vld [vmem:[%s2243_s11 + $0xec] ss:$16 sps:$4 sm:$0xff]  }
 0x664   : > { %1335 = vmatpush1.bf16.msra.mxu0 %v2659_v7  ;;  %1376 = vmatpush1.bf16.msra.mxu1 %v2663_v8  ;;  %v1888_v7 = vld [vmem:[%s2243_s11 + $0xe0] ss:$16 sps:$4 sm:$0xff]   ;;  %v1889_v8 = vld [vmem:[%s2243_s11 + $0xe8] ss:$16 sps:$4 sm:$0xff]   ;;  %s1957_s11 = scalar_lea.vmem %s1956_s7, 2048 }
 0x665   : > { %1336 = vmatprep.subr.bf16.mxu0 %v2667_v9  ;;  %1377 = vmatprep.subr.bf16.mxu1 %v1873_v43  ;;  %v1890_v9 = vld [vmem:[%s2809_s0] sm:$0xff]  ;;  %p1959_p9 = scmp.lt.s32.totalorder %s1957_s11, %s1951_s28 }
 0x666   : > { %vm1646_vm6 = vcmp.gt.s32.totalorder %v1890_v9, 7 }
 0x667   : > { %vm1437_vm7 = vmor %vm2346_vm0, %vm1646_vm6  ;;  %vm1318_vm0 = vcmp.eq.s32.totalorder %v1317_v40, 1  ;;  %p1960_p11 = por %p1959_p9, %p1958_p10 }
 0x668   : > { %1337 = vmatpush1.bf16.msra.mxu0 %v2672_v10  ;;  %1378 = vmatpush1.bf16.msra.mxu1 %v1874_v45  ;;  %v1438_v10 = vsel %vm1437_vm7, 1, %v2043_v0  ;;  %v1327_v45 = vunpack.c.l.bf16 %v1645_v42 }
 0x669   : > { %1338 = vmatprep.subr.bf16.mxu0 %v2677_v11  ;;  %1379 = vmatprep.subr.bf16.mxu1 %v1875_v46  ;;  %v1640_v11 = vld [vmem:[%s2235_s9 + $0x60] sm:$0xff]  ;;  %s1449_s9 = scalar_lea.sflag [#allocation6], %s2231_s8  ;;  %p1961_p1 = pnand %p1960_p11, %p1954_p7 }
 0x66a   : > { %1440 = vperm.xlu1 %1729, %v1438_v10   ;;  %v1201_v15 = vunpack.c.l.bf16 %v1640_v11  ;;  %v1202_v18 = vunpack.c.h.bf16 %v1640_v11 }
 0x66c   : > { %1339 = vmatpush1.bf16.msra.mxu0 %v1876_v48  ;;  %1380 = vmatpush1.bf16.msra.mxu1 %v1877_v49 }
 0x66d   : > { %1340 = vmatprep.subr.bf16.mxu0 %v1878_v50  ;;  %1381 = vmatprep.subr.bf16.mxu1 %v1879_v51 }
 0x670   : > { %1341 = vmatpush1.bf16.msra.mxu0 %v1880_v47  ;;  %1382 = vmatpush1.bf16.msra.mxu1 %v1881_v52 }
 0x671   : > { %1342 = vmatprep.subr.bf16.mxu0 %v1882_v54  ;;  %1383 = vmatprep.subr.bf16.mxu1 %v1883_v55 }
 0x674   : > { %1343 = vmatpush1.bf16.msra.mxu0 %v1884_v2  ;;  %1384 = vmatpush1.bf16.msra.mxu1 %v1885_v3  ;;  %v1328_v3 = vunpack.c.h.bf16 %v1645_v42 }
 0x675   : > { %1344 = vmatprep.subr.bf16.mxu0 %v1886_v5  ;;  %1385 = vmatprep.subr.bf16.mxu1 %v1887_v6 }
 0x678   : > { %1345 = vmatpush1.bf16.msra.mxu0 %v1888_v7  ;;  %1386 = vmatpush1.bf16.msra.mxu1 %v1889_v8 }
 0x72e   : > { %v1240_v19 = vpop.f32.mrb[24].mxu0  ;;  %v1281_v20 = vpop.f32.mrb[24].mxu1 }
 0x72f   : > { %v1288_v22 = vadd.f32 %v1240_v19, %v1201_v15  ;;  %v1242_v24 = vpop.f32.mrb[25].mxu0  ;;  %v1283_v25 = vpop.f32.mrb[25].mxu1  ;;  %v1290_v0 = vadd.f32 %v1281_v20, %v1203_v23 }
 0x730   : > { %v1289_v28 = vadd.f32 %v1242_v24, %v1202_v18  ;;  %v1244_v29 = vpop.f32.mrb[26].mxu0  ;;  %v1285_v30 = vpop.f32.mrb[26].mxu1  ;;  %v1291_v27 = vadd.f32 %v1283_v25, %v1204_v35 }
 0x731   : > { %v1292_v31 = vmul.f32 0.5, %v1288_v22  ;;  %v1245_v33 = vpop.f32.mrb[27].mxu0  ;;  %v1286_v26 = vpop.f32.mrb[27].mxu1 }
 0x732   : > { %v1296_v34 = vmul.f32 0.5, %v1289_v28  ;;  %v1301_v36 = vmul.f32 0.5, %v1291_v27  ;;  %v1441_v24 = vpop.permute.xlu1 %1440 }
 0x733   : > { %1838 = vtanh.f32 %v1292_v31  ;;  %vm1442_vm8 = vcmp.eq.s32.totalorder %v1441_v24, 1 }
 0x734   : > { %1840 = vtanh.f32 %v1296_v34 }
 0x735   : > { %1842 = vtanh.f32 %v1290_v0 }
 0x736   : > { %1844 = vtanh.f32 %v1301_v36 }
 0x73d   : > { %v1839_v12 = vpop.eup %1838 }
 0x73e   : > { %v1841_v1 = vpop.eup %1840  ;;  %v1294_v13 = vmul.f32 0.5, %v1839_v12 }
 0x73f   : > { %v1298_v4 = vmul.f32 0.5, %v1841_v1  ;;  %v1843_v16 = vpop.eup %1842 }
 0x740   : > { %v1295_v14 = vadd.f32 0.5, %v1294_v13  ;;  %v1845_v59 = vpop.eup %1844 }
 0x741   : > { %v1299_v21 = vadd.f32 0.5, %v1298_v4  ;;  %v1303_v60 = vmul.f32 0.5, %v1845_v59 }
 0x742   : > { %v1306_v56 = vmul.f32 %v1843_v16, %v1295_v14 }
 0x743   : > { %v1305_v57 = vmul.f32 %v1299_v21, %v2704_v63  ;;  %v1304_v61 = vadd.f32 0.5, %v1303_v60 }
 0x745   : > { %v1307_v58 = vadd.f32 %v1306_v56, %v1305_v57 }
 0x747   : > { %1846 = vtanh.f32 %v1307_v58 }
 0x751   : > { %v1847_v62 = vpop.eup %1846 }
 0x752   : > { %v1309_v32 = vmul.f32 %v1847_v62, %v1304_v61 }
 0x754   : > { %v1319_v37 = vsel %vm1318_vm0, %v1309_v32, 0.0  ;;  %v1329_v38 = vpack.c.bf16 %v1309_v32, %v1309_v32 }
 0x755   : > { %1643 = vst [vmem:[%s2441_s6 + $0x30] sm:$0xff] %v1319_v37 }
 0x756   : > { %1363 = vmatmul.mubr.bf16.vlgmr.msra.gmra.mrb[28].mxu0 %v1329_v38  ;;  %1404 = vmatmul.mubr.bf16.vlgmr.msra.gmra.mrb[28].mxu1 %v1329_v38 }
 0x829   : > { %v1364_v63 = vpop.f32.mrb[28].mxu0  ;;  %v1405_v44 = vpop.f32.mrb[28].mxu1 }
 0x82a   : > { %v1412_v43 = vadd.f32 %v1364_v63, %v1325_v41  ;;  %v1366_v46 = vpop.f32.mrb[29].mxu0  ;;  %v1407_v48 = vpop.f32.mrb[29].mxu1  ;;  %v1414_v2 = vadd.f32 %v1405_v44, %v1327_v45 }
 0x82b   : > { %v1413_v49 = vadd.f32 %v1366_v46, %v1326_v53  ;;  %v1368_v50 = vpop.f32.mrb[30].mxu0  ;;  %v1409_v51 = vpop.f32.mrb[30].mxu1  ;;  %v1415_v5 = vadd.f32 %v1407_v48, %v1328_v3 }
 0x82c   : > { %v1416_v47 = vmul.f32 0.5, %v1412_v43  ;;  %v1369_v52 = vpop.f32.mrb[31].mxu0  ;;  %v1410_v54 = vpop.f32.mrb[31].mxu1 }
 0x82d   : > { %v1420_v55 = vmul.f32 0.5, %v1413_v49  ;;  %v1425_v6 = vmul.f32 0.5, %v1415_v5 }
 0x82e   : > { %1848 = vtanh.f32 %v1416_v47 }
 0x82f   : > { %1850 = vtanh.f32 %v1420_v55 }
 0x830   : > { %1852 = vtanh.f32 %v1414_v2 }
 0x831   : > { %1854 = vtanh.f32 %v1425_v6 }
 0x838   : > { %v1849_v7 = vpop.eup %1848 }
 0x839   : > { %v1851_v8 = vpop.eup %1850  ;;  %v1418_v9 = vmul.f32 0.5, %v1849_v7 }
 0x83a   : > { %v1422_v10 = vmul.f32 0.5, %v1851_v8  ;;  %v1853_v15 = vpop.eup %1852 }
 0x83b   : > { %v1419_v11 = vadd.f32 0.5, %v1418_v9  ;;  %v1855_v22 = vpop.eup %1854 }
 0x83c   : > { %v1423_v17 = vadd.f32 0.5, %v1422_v10  ;;  %v1427_v23 = vmul.f32 0.5, %v1855_v22 }
 0x83d   : > { %v1430_v18 = vmul.f32 %v1853_v15, %v1419_v11 }
 0x83e   : > { %v1429_v19 = vmul.f32 %v1423_v17, %v1307_v58  ;;  %v1428_v25 = vadd.f32 0.5, %v1427_v23 }
 0x840   : > { %v1431_v20 = vadd.f32 %v1430_v18, %v1429_v19 }
 0x842   : > { %1856 = vtanh.f32 %v1431_v20 }
 0x84c   : > { %v1857_v28 = vpop.eup %1856 }
 0x84d   : > { %v1433_v29 = vmul.f32 %v1857_v28, %v1428_v25 }
 0x84f   : > { %v1443_v30 = vsel %vm1442_vm8, %v1433_v29, 0.0 }
 0x850   : > { %1647 = vst [vmem:[%s2441_s6 + $0x38] sm:$0xff] %v1443_v30 }
 0x851   : > { %1964 = shalt.err (!%p1961_p1)
}
 0x852   : > { %s1965_s24 = scalar_lea.hbm %s2759_s22, 1024  ;;  %s1969_s4 = scalar_lea.hbm %s2812_s3, 2048 }
 0x853   : > { %p1966_p6 = scmp.ne.s32.totalorder %s2759_s22, %s1965_s24  ;;  %p1970_p4 = scmp.lt.u32.totalorder %s2759_s22, %s2812_s3 }
 0x854   : > { %p1971_p8 = scmp.lt.u32.totalorder %s1969_s4, %s1965_s24  ;;  %p1973_p3 = scmp.lt.u32.totalorder %s1965_s24, %s2759_s22 }
 0x855   : > { %p1967_p2 = pnand %p1966_p6, %p2825_p12 }
 0x856   : > { %p1972_p0 = por %p1971_p8, %p1970_p4 }
 0x857   : > { %p1968_p5 = pneg %p1967_p2 }
 0x858   : > { %p1974_p13 = por %p1973_p3, %p1972_p0 }
 0x85a   : > { %p1975_p7 = pnand %p1974_p13, %p1968_p5 }
 0x85c   : > { %1978 = shalt.err (!%p1975_p7)
}
 0x85d   : > { %s2046_s18 = smov 128   ;;  %s2047_s10 = smov 256  }
 0x85e   : > { %s2048_s5 = smov 8  }
 0x85f   : > { %1658 = dma.vmem_to_hbm [thread:$0]  (%p2825_p12), %s2754_s30, 1024, %s2759_s22, %s1449_s9, %s2046_s18, %s2047_s10, %s2048_s5  }
 0x860 PF: > { %s1479_s19 = sand.u32 1, %s2017_s12   ;;  %p2826_p10 = scmp.ne.s32.totalorder %s2818_s27, 0 }
 0x861   : > { %p2827_p9 = scmp.ge.s32.totalorder %s2037_s17, 2  ;;  %s1480_s28 = scalar_lea.sflag [#allocation6], %s1479_s19 }
 0x863   : > { %p1668_p11 = pnand %p2827_p9, %p2826_p10 }
 0x865   : > { %2012 = dma.done.wait (!%p1668_p11), %s1480_s28, 1024  }
 0x866   : > { %2014 = vsyncadd (!%p1668_p11), %s1480_s28, 4294966272  ;;  %s22_s17 = sadd.s32 1, %s2037_s17   ;;  %s2828_s12 = smov %s2021_s13 }
 0x867   : > { %p19_p1 = scmp.ge.s32.totalorder %s22_s17, 4   ;;  %s2829_s13 = smov %s2025_s14 }
 0x868   : > { %s2830_s14 = smov %s2125_s26  ;;  %s2831_s15 = smov %s2033_s16 }
 0x869   : > { %s2832_s16 = smov %s2834_s20  ;;  %21 = sbr.rel (!%p19_p1) target bundleno = 8 (0x8), region = 108 }
 0x870   :  { %1485 = vsyncpa [#allocation5], 1 }
 0x871   :  { %1487 = vsyncpa [#allocation5 + $0x1], 1 }
 0x872   :  { %1488 = vsyncpa [#allocation8], 1 }
 0x873   :  { %1490 = vsyncpa [#allocation8 + $0x1], 1 }
 0x874   :  { %1491 = vsyncpa [#allocation6], 1 }
 0x875   :  { %1493 = vsyncpa [#allocation6 + $0x1], 1 }

</bundles_post_ra>
